<compile_context>
chip_gen: v7x
topology: tpu7x:2x2x1
jax: 0.10.0
libtpu: 0.0.40
codegen_flags: <defaults>
</compile_context>

<pallas_src>
import functools

import jax
import jax.numpy as jnp
import numpy as np
from jax.experimental import pallas as pl
from jax.experimental.pallas import tpu as pltpu

BN_EPS = 1e-5


def _conv_rows(x_ref, w_ref, row0, th, mxu_dtype):
    """3x3 'valid' conv over padded rows [row0, row0+th+2) of x_ref.

    x_ref : (H+2, W+2, Cin)  zero-padded NHWC image (resident VMEM block)
    w_ref : (9, Cin, CPAD)   conv weights, tap-major, Cout zero-padded to CPAD
    returns (th*W, CPAD) f32 accumulator.
    """
    _, wp, cin = x_ref.shape
    w_out = wp - 2
    cpad = w_ref.shape[-1]

    acc = jnp.zeros((th * w_out, cpad), jnp.float32)
    k = 0
    for dy in range(3):
        for dx in range(3):
            # Read each tap directly from the ref (halo handled by the slice window).
            tap = x_ref[pl.ds(row0 + dy, th), pl.ds(dx, w_out), :]      # (th, W, Cin)
            lhs = tap.reshape(th * w_out, cin).astype(mxu_dtype)
            rhs = w_ref[k].astype(mxu_dtype)                            # (Cin, CPAD)
            acc = acc + jnp.dot(lhs, rhs, preferred_element_type=jnp.float32)
            k += 1
    return acc


def _stats_kernel(x_ref, w_ref, sum_ref, ssq_ref, *, th, mxu_dtype):
    """Pass 1: accumulate per-channel sum and sum-of-squares of the conv output."""
    n = pl.program_id(0)
    h = pl.program_id(1)

    @pl.when((n == 0) & (h == 0))
    def _init():
        sum_ref[...] = jnp.zeros_like(sum_ref)
        ssq_ref[...] = jnp.zeros_like(ssq_ref)

    row0 = pl.multiple_of(h * th, th)
    y = _conv_rows(x_ref, w_ref, row0, th, mxu_dtype)                   # (th*W, CPAD)

    # Column sums as a ones-vector matmul (MXU) instead of an XLU cross-sublane reduce.
    ones = jnp.ones((1, y.shape[0]), jnp.float32)
    sum_ref[...] += jnp.dot(ones, y, preferred_element_type=jnp.float32)
    ssq_ref[...] += jnp.dot(ones, y * y, preferred_element_type=jnp.float32)


def _apply_kernel(x_ref, w_ref, a_ref, b_ref, o_ref, *, th, mxu_dtype):
    """Pass 2: recompute conv for the tile, apply folded BN (y*a + b) + ReLU, store."""
    h = pl.program_id(1)
    row0 = pl.multiple_of(h * th, th)
    y = _conv_rows(x_ref, w_ref, row0, th, mxu_dtype)                   # (th*W, CPAD)
    y = y * a_ref[...] + b_ref[...]                                     # folded BN epilogue
    y = jnp.maximum(y, 0.0)                                             # ReLU
    o_ref[...] = y.reshape(o_ref.shape).astype(o_ref.dtype)             # lane-dense store


def conv_block_forward(x_nchw, weight, gamma, beta, *, eps=BN_EPS, th=8,
                       cpad=128, mxu_dtype=jnp.float32):
    """x: (N,Cin,H,W); weight: (Cout,Cin,3,3); gamma/beta: (Cout,).  Returns (N,Cout,H,W)."""
    N, Cin, H, W = x_nchw.shape
    Cout = weight.shape[0]
    assert H % th == 0, "row-tile must divide H"
    n_h = H // th
    Hp, Wp = H + 2, W + 2

    # Glue: NCHW->NHWC fused with the 1-px zero pad (single XLA copy pass under jit).
    x_pad = jnp.pad(jnp.transpose(x_nchw, (0, 2, 3, 1)), ((0, 0), (1, 1), (1, 1), (0, 0)))

    # Weights: (Cout,Cin,3,3) -> (9, Cin, CPAD), Cout zero-padded to 128 for lane density.
    w = jnp.transpose(weight, (2, 3, 1, 0)).reshape(9, Cin, Cout)
    w = jnp.pad(w, ((0, 0), (0, 0), (0, cpad - Cout)))

    x_spec = pl.BlockSpec((None, Hp, Wp, Cin), lambda n, h: (n, 0, 0, 0))
    w_spec = pl.BlockSpec((9, Cin, cpad), lambda n, h: (0, 0, 0))
    vec_spec = pl.BlockSpec((1, cpad), lambda n, h: (0, 0))

    # VMEM footprint (f32, double-buffered): x block ~10 KiB, w ~36 KiB, out tile
    # th*W*cpad*4*2 = 128 KiB, vectors ~2 KiB  ->  well under the 32 MiB limit and under
    # v7x's 64 MiB physical VMEM.  On v6e/v5e (128 MiB) `th` can be raised for larger H.
    cparams_stats = pltpu.CompilerParams(
        dimension_semantics=("arbitrary", "arbitrary"),   # resident accumulator outputs
        vmem_limit_bytes=32 * 1024 * 1024)
    cparams_apply = pltpu.CompilerParams(
        dimension_semantics=("parallel", "parallel"),     # v7x: split grid across both TCs
        vmem_limit_bytes=32 * 1024 * 1024)

    # ---- pass 1: global batch statistics (sum, sum of squares) ----
    s, ss = pl.pallas_call(
        functools.partial(_stats_kernel, th=th, mxu_dtype=mxu_dtype),
        grid=(N, n_h),
        in_specs=[x_spec, w_spec],
        out_specs=(vec_spec, vec_spec),
        out_shape=(jax.ShapeDtypeStruct((1, cpad), jnp.float32),
                   jax.ShapeDtypeStruct((1, cpad), jnp.float32)),
        compiler_params=cparams_stats,
    )(x_pad, w)

    # ---- tiny glue: fold BN into per-channel scale/shift (128-element vector math) ----
    # f32 accumulators; E[x^2]-E[x]^2 is safe at these magnitudes (inputs ~ N(0,1)).
    cnt = jnp.float32(N * H * W)
    mean = s / cnt
    var = ss / cnt - mean * mean
    inv_std = jax.lax.rsqrt(var + eps)
    gamma_p = jnp.pad(gamma, (0, cpad - Cout)).reshape(1, cpad)
    beta_p = jnp.pad(beta, (0, cpad - Cout)).reshape(1, cpad)
    a = gamma_p * inv_std
    b = beta_p - mean * a

    # ---- pass 2: conv recompute + folded BN + ReLU, lane-dense (CPAD=128) output ----
    out_spec = pl.BlockSpec((None, th, W, cpad), lambda n, h: (n, h, 0, 0))
    y = pl.pallas_call(
        functools.partial(_apply_kernel, th=th, mxu_dtype=mxu_dtype),
        grid=(N, n_h),
        in_specs=[x_spec, w_spec, vec_spec, vec_spec],
        out_specs=out_spec,
        out_shape=jax.ShapeDtypeStruct((N, H, W, cpad), jnp.float32),
        compiler_params=cparams_apply,
    )(x_pad, w, a, b)

    # Glue: drop channel padding + NHWC->NCHW (slice + transpose fuse into one XLA pass).
    return jnp.transpose(y[..., :Cout], (0, 3, 1, 2))


def _reference(x_nchw, weight, gamma, beta, eps=BN_EPS):
    """Pure-JAX reference mirroring the PyTorch ConvBlock forward (train-mode BN)."""
    y = jax.lax.conv_general_dilated(
        x_nchw, weight, window_strides=(1, 1), padding=((1, 1), (1, 1)),
        dimension_numbers=("NCHW", "OIHW", "NCHW"))
    mean = jnp.mean(y, axis=(0, 2, 3), keepdims=True)
    var = jnp.mean((y - mean) ** 2, axis=(0, 2, 3), keepdims=True)
    y = (y - mean) * jax.lax.rsqrt(var + eps)
    y = y * gamma[None, :, None, None] + beta[None, :, None, None]
    return jnp.maximum(y, 0.0)


if __name__ == "__main__":
    key = jax.random.PRNGKey(0)
    N, Cin, Cout, H, W = 2, 4, 8, 16, 16

    k1, k2, k3, k4 = jax.random.split(key, 4)
    x = jax.random.normal(k1, (N, Cin, H, W), jnp.float32)
    weight = jax.random.normal(k2, (Cout, Cin, 3, 3), jnp.float32) / np.sqrt(9 * Cin)
    gamma = 1.0 + 0.1 * jax.random.normal(k3, (Cout,), jnp.float32)
    beta = 0.1 * jax.random.normal(k4, (Cout,), jnp.float32)

    fwd = jax.jit(conv_block_forward)
    out = jax.block_until_ready(fwd(x, weight, gamma, beta))

    ref = jax.block_until_ready(_reference(x, weight, gamma, beta))
    np.testing.assert_allclose(np.asarray(out), np.asarray(ref), rtol=1e-4, atol=1e-4)

    print("KERNEL_OK")
</pallas_src>

<mosaic_0001>
module attributes {stable_mosaic.version = 11 : i64} {
  func.func @_stats_kernel(%arg0: i32, %arg1: i32, %arg2: memref<1x18x18x4xf32, #tpu.memory_space<vmem>>, %arg3: memref<9x4x128xf32, #tpu.memory_space<vmem>>, %arg4: memref<1x128xf32, #tpu.memory_space<vmem>>, %arg5: memref<1x128xf32, #tpu.memory_space<vmem>>) attributes {dimension_semantics = [#tpu.dimension_semantics<arbitrary>, #tpu.dimension_semantics<arbitrary>], iteration_bounds = array<i64: 2, 2>, scalar_prefetch = 0 : i64, scratch_operands = 0 : i64, tpu.core_type = #tpu.core_type<tc>, window_params = [{transform_indices = @transform_0, window_bounds = array<i64: 1, 18, 18, 4>}, {pipeline_mode = #tpu.pipeline_mode<synchronous>, transform_indices = @transform_1, window_bounds = array<i64: 9, 4, 128>}, {pipeline_mode = #tpu.pipeline_mode<synchronous>, transform_indices = @transform_2, window_bounds = array<i64: 1, 128>}, {pipeline_mode = #tpu.pipeline_mode<synchronous>, transform_indices = @transform_3, window_bounds = array<i64: 1, 128>}]} {
    %c0_i32 = arith.constant 0 : i32
    %0 = arith.cmpi eq, %arg0, %c0_i32 : i32
    %c0_i32_0 = arith.constant 0 : i32
    %1 = arith.cmpi eq, %arg1, %c0_i32_0 : i32
    %2 = arith.andi %0, %1 : i1
    %3 = arith.extui %2 : i1 to i32
    %c0_i32_1 = arith.constant 0 : i32
    %4 = arith.cmpi ne, %3, %c0_i32_1 : i32
    scf.if %4 {
      %cst_74 = arith.constant 0.000000e+00 : f32
      %99 = vector.broadcast %cst_74 : f32 to vector<1x128xf32>
      %c0_75 = arith.constant 0 : index
      %c0_76 = arith.constant 0 : index
      %100 = vector.load %arg4[%c0_75, %c0_76] : memref<1x128xf32, #tpu.memory_space<vmem>>, vector<1x128xf32>
      tpu.vector_store %arg4[%c0_75, %c0_76], %99 {strides = array<i32>} : memref<1x128xf32, #tpu.memory_space<vmem>>, vector<1x128xf32>,
      %cst_77 = arith.constant 0.000000e+00 : f32
      %101 = vector.broadcast %cst_77 : f32 to vector<1x128xf32>
      %c0_78 = arith.constant 0 : index
      %c0_79 = arith.constant 0 : index
      %102 = vector.load %arg5[%c0_78, %c0_79] : memref<1x128xf32, #tpu.memory_space<vmem>>, vector<1x128xf32>
      tpu.vector_store %arg5[%c0_78, %c0_79], %101 {strides = array<i32>} : memref<1x128xf32, #tpu.memory_space<vmem>>, vector<1x128xf32>,
    } else {
    }
    %c8_i32 = arith.constant 8 : i32
    %5 = arith.muli %arg1, %c8_i32 : i32
    %6 = tpu.assume_multiple %5, 8 : i32
    %cst = arith.constant 0.000000e+00 : f32
    %7 = vector.broadcast %cst : f32 to vector<128x128xf32>
    %c0_i32_2 = arith.constant 0 : i32
    %8 = arith.addi %6, %c0_i32_2 : i32
    %c0 = arith.constant 0 : index
    %9 = arith.index_cast %8 : i32 to index
    %c0_3 = arith.constant 0 : index
    %c0_4 = arith.constant 0 : index
    %10 = vector.load %arg2[%c0, %9, %c0_3, %c0_4] : memref<1x18x18x4xf32, #tpu.memory_space<vmem>>, vector<1x8x16x4xf32>
    %11 = vector.shape_cast %10 : vector<1x8x16x4xf32> to vector<8x16x4xf32>
    %12 = vector.shape_cast %11 : vector<8x16x4xf32> to vector<128x4xf32>
    %c0_5 = arith.constant 0 : index
    %c0_6 = arith.constant 0 : index
    %c0_7 = arith.constant 0 : index
    %13 = vector.load %arg3[%c0_5, %c0_6, %c0_7] : memref<9x4x128xf32, #tpu.memory_space<vmem>>, vector<1x4x128xf32>
    %14 = vector.shape_cast %13 : vector<1x4x128xf32> to vector<4x128xf32>
    %cst_8 = arith.constant dense<0.000000e+00> : vector<128x128xf32>
    %15 = tpu.matmul %12, %14, %cst_8 {dimension_numbers = #tpu.dot_dimension_numbers<[1], [0], [0], [1], [0, 0, 1, 1], [], []>} : vector<128x4xf32>, vector<4x128xf32>, vector<128x128xf32> -> vector<128x128xf32>
    %16 = arith.addf %7, %15 : vector<128x128xf32>
    %c0_i32_9 = arith.constant 0 : i32
    %17 = arith.addi %6, %c0_i32_9 : i32
    %c0_10 = arith.constant 0 : index
    %18 = arith.index_cast %17 : i32 to index
    %c1 = arith.constant 1 : index
    %c0_11 = arith.constant 0 : index
    %19 = vector.load %arg2[%c0_10, %18, %c1, %c0_11] : memref<1x18x18x4xf32, #tpu.memory_space<vmem>>, vector<1x8x16x4xf32>
    %20 = vector.shape_cast %19 : vector<1x8x16x4xf32> to vector<8x16x4xf32>
    %21 = vector.shape_cast %20 : vector<8x16x4xf32> to vector<128x4xf32>
    %c1_12 = arith.constant 1 : index
    %c0_13 = arith.constant 0 : index
    %c0_14 = arith.constant 0 : index
    %22 = vector.load %arg3[%c1_12, %c0_13, %c0_14] : memref<9x4x128xf32, #tpu.memory_space<vmem>>, vector<1x4x128xf32>
    %23 = vector.shape_cast %22 : vector<1x4x128xf32> to vector<4x128xf32>
    %cst_15 = arith.constant dense<0.000000e+00> : vector<128x128xf32>
    %24 = tpu.matmul %21, %23, %cst_15 {dimension_numbers = #tpu.dot_dimension_numbers<[1], [0], [0], [1], [0, 0, 1, 1], [], []>} : vector<128x4xf32>, vector<4x128xf32>, vector<128x128xf32> -> vector<128x128xf32>
    %25 = arith.addf %16, %24 : vector<128x128xf32>
    %c0_i32_16 = arith.constant 0 : i32
    %26 = arith.addi %6, %c0_i32_16 : i32
    %c0_17 = arith.constant 0 : index
    %27 = arith.index_cast %26 : i32 to index
    %c2 = arith.constant 2 : index
    %c0_18 = arith.constant 0 : index
    %28 = vector.load %arg2[%c0_17, %27, %c2, %c0_18] : memref<1x18x18x4xf32, #tpu.memory_space<vmem>>, vector<1x8x16x4xf32>
    %29 = vector.shape_cast %28 : vector<1x8x16x4xf32> to vector<8x16x4xf32>
    %30 = vector.shape_cast %29 : vector<8x16x4xf32> to vector<128x4xf32>
    %c2_19 = arith.constant 2 : index
    %c0_20 = arith.constant 0 : index
    %c0_21 = arith.constant 0 : index
    %31 = vector.load %arg3[%c2_19, %c0_20, %c0_21] : memref<9x4x128xf32, #tpu.memory_space<vmem>>, vector<1x4x128xf32>
    %32 = vector.shape_cast %31 : vector<1x4x128xf32> to vector<4x128xf32>
    %cst_22 = arith.constant dense<0.000000e+00> : vector<128x128xf32>
    %33 = tpu.matmul %30, %32, %cst_22 {dimension_numbers = #tpu.dot_dimension_numbers<[1], [0], [0], [1], [0, 0, 1, 1], [], []>} : vector<128x4xf32>, vector<4x128xf32>, vector<128x128xf32> -> vector<128x128xf32>
    %34 = arith.addf %25, %33 : vector<128x128xf32>
    %c1_i32 = arith.constant 1 : i32
    %35 = arith.addi %6, %c1_i32 : i32
    %c0_23 = arith.constant 0 : index
    %36 = arith.index_cast %35 : i32 to index
    %c0_24 = arith.constant 0 : index
    %c0_25 = arith.constant 0 : index
    %37 = vector.load %arg2[%c0_23, %36, %c0_24, %c0_25] : memref<1x18x18x4xf32, #tpu.memory_space<vmem>>, vector<1x8x16x4xf32>
    %38 = vector.shape_cast %37 : vector<1x8x16x4xf32> to vector<8x16x4xf32>
    %39 = vector.shape_cast %38 : vector<8x16x4xf32> to vector<128x4xf32>
    %c3 = arith.constant 3 : index
    %c0_26 = arith.constant 0 : index
    %c0_27 = arith.constant 0 : index
    %40 = vector.load %arg3[%c3, %c0_26, %c0_27] : memref<9x4x128xf32, #tpu.memory_space<vmem>>, vector<1x4x128xf32>
    %41 = vector.shape_cast %40 : vector<1x4x128xf32> to vector<4x128xf32>
    %cst_28 = arith.constant dense<0.000000e+00> : vector<128x128xf32>
    %42 = tpu.matmul %39, %41, %cst_28 {dimension_numbers = #tpu.dot_dimension_numbers<[1], [0], [0], [1], [0, 0, 1, 1], [], []>} : vector<128x4xf32>, vector<4x128xf32>, vector<128x128xf32> -> vector<128x128xf32>
    %43 = arith.addf %34, %42 : vector<128x128xf32>
    %c1_i32_29 = arith.constant 1 : i32
    %44 = arith.addi %6, %c1_i32_29 : i32
    %c0_30 = arith.constant 0 : index
    %45 = arith.index_cast %44 : i32 to index
    %c1_31 = arith.constant 1 : index
    %c0_32 = arith.constant 0 : index
    %46 = vector.load %arg2[%c0_30, %45, %c1_31, %c0_32] : memref<1x18x18x4xf32, #tpu.memory_space<vmem>>, vector<1x8x16x4xf32>
    %47 = vector.shape_cast %46 : vector<1x8x16x4xf32> to vector<8x16x4xf32>
    %48 = vector.shape_cast %47 : vector<8x16x4xf32> to vector<128x4xf32>
    %c4 = arith.constant 4 : index
    %c0_33 = arith.constant 0 : index
    %c0_34 = arith.constant 0 : index
    %49 = vector.load %arg3[%c4, %c0_33, %c0_34] : memref<9x4x128xf32, #tpu.memory_space<vmem>>, vector<1x4x128xf32>
    %50 = vector.shape_cast %49 : vector<1x4x128xf32> to vector<4x128xf32>
    %cst_35 = arith.constant dense<0.000000e+00> : vector<128x128xf32>
    %51 = tpu.matmul %48, %50, %cst_35 {dimension_numbers = #tpu.dot_dimension_numbers<[1], [0], [0], [1], [0, 0, 1, 1], [], []>} : vector<128x4xf32>, vector<4x128xf32>, vector<128x128xf32> -> vector<128x128xf32>
    %52 = arith.addf %43, %51 : vector<128x128xf32>
    %c1_i32_36 = arith.constant 1 : i32
    %53 = arith.addi %6, %c1_i32_36 : i32
    %c0_37 = arith.constant 0 : index
    %54 = arith.index_cast %53 : i32 to index
    %c2_38 = arith.constant 2 : index
    %c0_39 = arith.constant 0 : index
    %55 = vector.load %arg2[%c0_37, %54, %c2_38, %c0_39] : memref<1x18x18x4xf32, #tpu.memory_space<vmem>>, vector<1x8x16x4xf32>
    %56 = vector.shape_cast %55 : vector<1x8x16x4xf32> to vector<8x16x4xf32>
    %57 = vector.shape_cast %56 : vector<8x16x4xf32> to vector<128x4xf32>
    %c5 = arith.constant 5 : index
    %c0_40 = arith.constant 0 : index
    %c0_41 = arith.constant 0 : index
    %58 = vector.load %arg3[%c5, %c0_40, %c0_41] : memref<9x4x128xf32, #tpu.memory_space<vmem>>, vector<1x4x128xf32>
    %59 = vector.shape_cast %58 : vector<1x4x128xf32> to vector<4x128xf32>
    %cst_42 = arith.constant dense<0.000000e+00> : vector<128x128xf32>
    %60 = tpu.matmul %57, %59, %cst_42 {dimension_numbers = #tpu.dot_dimension_numbers<[1], [0], [0], [1], [0, 0, 1, 1], [], []>} : vector<128x4xf32>, vector<4x128xf32>, vector<128x128xf32> -> vector<128x128xf32>
    %61 = arith.addf %52, %60 : vector<128x128xf32>
    %c2_i32 = arith.constant 2 : i32
    %62 = arith.addi %6, %c2_i32 : i32
    %c0_43 = arith.constant 0 : index
    %63 = arith.index_cast %62 : i32 to index
    %c0_44 = arith.constant 0 : index
    %c0_45 = arith.constant 0 : index
    %64 = vector.load %arg2[%c0_43, %63, %c0_44, %c0_45] : memref<1x18x18x4xf32, #tpu.memory_space<vmem>>, vector<1x8x16x4xf32>
    %65 = vector.shape_cast %64 : vector<1x8x16x4xf32> to vector<8x16x4xf32>
    %66 = vector.shape_cast %65 : vector<8x16x4xf32> to vector<128x4xf32>
    %c6 = arith.constant 6 : index
    %c0_46 = arith.constant 0 : index
    %c0_47 = arith.constant 0 : index
    %67 = vector.load %arg3[%c6, %c0_46, %c0_47] : memref<9x4x128xf32, #tpu.memory_space<vmem>>, vector<1x4x128xf32>
    %68 = vector.shape_cast %67 : vector<1x4x128xf32> to vector<4x128xf32>
    %cst_48 = arith.constant dense<0.000000e+00> : vector<128x128xf32>
    %69 = tpu.matmul %66, %68, %cst_48 {dimension_numbers = #tpu.dot_dimension_numbers<[1], [0], [0], [1], [0, 0, 1, 1], [], []>} : vector<128x4xf32>, vector<4x128xf32>, vector<128x128xf32> -> vector<128x128xf32>
    %70 = arith.addf %61, %69 : vector<128x128xf32>
    %c2_i32_49 = arith.constant 2 : i32
    %71 = arith.addi %6, %c2_i32_49 : i32
    %c0_50 = arith.constant 0 : index
    %72 = arith.index_cast %71 : i32 to index
    %c1_51 = arith.constant 1 : index
    %c0_52 = arith.constant 0 : index
    %73 = vector.load %arg2[%c0_50, %72, %c1_51, %c0_52] : memref<1x18x18x4xf32, #tpu.memory_space<vmem>>, vector<1x8x16x4xf32>
    %74 = vector.shape_cast %73 : vector<1x8x16x4xf32> to vector<8x16x4xf32>
    %75 = vector.shape_cast %74 : vector<8x16x4xf32> to vector<128x4xf32>
    %c7 = arith.constant 7 : index
    %c0_53 = arith.constant 0 : index
    %c0_54 = arith.constant 0 : index
    %76 = vector.load %arg3[%c7, %c0_53, %c0_54] : memref<9x4x128xf32, #tpu.memory_space<vmem>>, vector<1x4x128xf32>
    %77 = vector.shape_cast %76 : vector<1x4x128xf32> to vector<4x128xf32>
    %cst_55 = arith.constant dense<0.000000e+00> : vector<128x128xf32>
    %78 = tpu.matmul %75, %77, %cst_55 {dimension_numbers = #tpu.dot_dimension_numbers<[1], [0], [0], [1], [0, 0, 1, 1], [], []>} : vector<128x4xf32>, vector<4x128xf32>, vector<128x128xf32> -> vector<128x128xf32>
    %79 = arith.addf %70, %78 : vector<128x128xf32>
    %c2_i32_56 = arith.constant 2 : i32
    %80 = arith.addi %6, %c2_i32_56 : i32
    %c0_57 = arith.constant 0 : index
    %81 = arith.index_cast %80 : i32 to index
    %c2_58 = arith.constant 2 : index
    %c0_59 = arith.constant 0 : index
    %82 = vector.load %arg2[%c0_57, %81, %c2_58, %c0_59] : memref<1x18x18x4xf32, #tpu.memory_space<vmem>>, vector<1x8x16x4xf32>
    %83 = vector.shape_cast %82 : vector<1x8x16x4xf32> to vector<8x16x4xf32>
    %84 = vector.shape_cast %83 : vector<8x16x4xf32> to vector<128x4xf32>
    %c8 = arith.constant 8 : index
    %c0_60 = arith.constant 0 : index
    %c0_61 = arith.constant 0 : index
    %85 = vector.load %arg3[%c8, %c0_60, %c0_61] : memref<9x4x128xf32, #tpu.memory_space<vmem>>, vector<1x4x128xf32>
    %86 = vector.shape_cast %85 : vector<1x4x128xf32> to vector<4x128xf32>
    %cst_62 = arith.constant dense<0.000000e+00> : vector<128x128xf32>
    %87 = tpu.matmul %84, %86, %cst_62 {dimension_numbers = #tpu.dot_dimension_numbers<[1], [0], [0], [1], [0, 0, 1, 1], [], []>} : vector<128x4xf32>, vector<4x128xf32>, vector<128x128xf32> -> vector<128x128xf32>
    %88 = arith.addf %79, %87 : vector<128x128xf32>
    %cst_63 = arith.constant 1.000000e+00 : f32
    %89 = vector.broadcast %cst_63 : f32 to vector<1x128xf32>
    %c0_64 = arith.constant 0 : index
    %c0_65 = arith.constant 0 : index
    %90 = vector.load %arg4[%c0_64, %c0_65] : memref<1x128xf32, #tpu.memory_space<vmem>>, vector<1x128xf32>
    %cst_66 = arith.constant dense<0.000000e+00> : vector<1x128xf32>
    %91 = tpu.matmul %89, %88, %cst_66 {dimension_numbers = #tpu.dot_dimension_numbers<[1], [0], [0], [1], [0, 0, 1, 1], [], []>} : vector<1x128xf32>, vector<128x128xf32>, vector<1x128xf32> -> vector<1x128xf32>
    %92 = arith.addf %90, %91 : vector<1x128xf32>
    %c0_67 = arith.constant 0 : index
    %c0_68 = arith.constant 0 : index
    %93 = vector.load %arg4[%c0_67, %c0_68] : memref<1x128xf32, #tpu.memory_space<vmem>>, vector<1x128xf32>
    tpu.vector_store %arg4[%c0_67, %c0_68], %92 {strides = array<i32>} : memref<1x128xf32, #tpu.memory_space<vmem>>, vector<1x128xf32>,
    %c0_69 = arith.constant 0 : index
    %c0_70 = arith.constant 0 : index
    %94 = vector.load %arg5[%c0_69, %c0_70] : memref<1x128xf32, #tpu.memory_space<vmem>>, vector<1x128xf32>
    %95 = arith.mulf %88, %88 : vector<128x128xf32>
    %cst_71 = arith.constant dense<0.000000e+00> : vector<1x128xf32>
    %96 = tpu.matmul %89, %95, %cst_71 {dimension_numbers = #tpu.dot_dimension_numbers<[1], [0], [0], [1], [0, 0, 1, 1], [], []>} : vector<1x128xf32>, vector<128x128xf32>, vector<1x128xf32> -> vector<1x128xf32>
    %97 = arith.addf %94, %96 : vector<1x128xf32>
    %c0_72 = arith.constant 0 : index
    %c0_73 = arith.constant 0 : index
    %98 = vector.load %arg5[%c0_72, %c0_73] : memref<1x128xf32, #tpu.memory_space<vmem>>, vector<1x128xf32>
    tpu.vector_store %arg5[%c0_72, %c0_73], %97 {strides = array<i32>} : memref<1x128xf32, #tpu.memory_space<vmem>>, vector<1x128xf32>,
    return
  }
  func.func @transform_0(%arg0: i32, %arg1: i32) -> (i32, i32, i32, i32) {
    %c0_i32 = arith.constant 0 : i32
    %c0_i32_0 = arith.constant 0 : i32
    %c0_i32_1 = arith.constant 0 : i32
    %c0_i32_2 = arith.constant 0 : i32
    return %arg0, %c0_i32, %c0_i32_0, %c0_i32_1 : i32, i32, i32, i32
  }
  func.func @transform_1(%arg0: i32, %arg1: i32) -> (i32, i32, i32) {
    %c0_i32 = arith.constant 0 : i32
    %c0_i32_0 = arith.constant 0 : i32
    %c0_i32_1 = arith.constant 0 : i32
    %c0_i32_2 = arith.constant 0 : i32
    return %c0_i32, %c0_i32_0, %c0_i32_1 : i32, i32, i32
  }
  func.func @transform_2(%arg0: i32, %arg1: i32) -> (i32, i32) {
    %c0_i32 = arith.constant 0 : i32
    %c0_i32_0 = arith.constant 0 : i32
    %c0_i32_1 = arith.constant 0 : i32
    return %c0_i32, %c0_i32_0 : i32, i32
  }
  func.func @transform_3(%arg0: i32, %arg1: i32) -> (i32, i32) {
    %c0_i32 = arith.constant 0 : i32
    %c0_i32_0 = arith.constant 0 : i32
    %c0_i32_1 = arith.constant 0 : i32
    return %c0_i32, %c0_i32_0 : i32, i32
  }
}

module attributes {stable_mosaic.version = 11 : i64} {
  func.func @_apply_kernel(%arg0: i32, %arg1: i32, %arg2: memref<1x18x18x4xf32, #tpu.memory_space<vmem>>, %arg3: memref<9x4x128xf32, #tpu.memory_space<vmem>>, %arg4: memref<1x128xf32, #tpu.memory_space<vmem>>, %arg5: memref<1x128xf32, #tpu.memory_space<vmem>>, %arg6: memref<1x8x16x128xf32, #tpu.memory_space<vmem>>) attributes {dimension_semantics = [#tpu.dimension_semantics<parallel>, #tpu.dimension_semantics<parallel>], iteration_bounds = array<i64: 2, 2>, scalar_prefetch = 0 : i64, scratch_operands = 0 : i64, tpu.core_type = #tpu.core_type<tc>, window_params = [{transform_indices = @transform_0, window_bounds = array<i64: 1, 18, 18, 4>}, {pipeline_mode = #tpu.pipeline_mode<synchronous>, transform_indices = @transform_1, window_bounds = array<i64: 9, 4, 128>}, {pipeline_mode = #tpu.pipeline_mode<synchronous>, transform_indices = @transform_2, window_bounds = array<i64: 1, 128>}, {pipeline_mode = #tpu.pipeline_mode<synchronous>, transform_indices = @transform_3, window_bounds = array<i64: 1, 128>}, {transform_indices = @transform_4, window_bounds = array<i64: 1, 8, 16, 128>}]} {
    %c8_i32 = arith.constant 8 : i32
    %0 = arith.muli %arg1, %c8_i32 : i32
    %1 = tpu.assume_multiple %0, 8 : i32
    %cst = arith.constant 0.000000e+00 : f32
    %2 = vector.broadcast %cst : f32 to vector<128x128xf32>
    %c0_i32 = arith.constant 0 : i32
    %3 = arith.addi %1, %c0_i32 : i32
    %c0 = arith.constant 0 : index
    %4 = arith.index_cast %3 : i32 to index
    %c0_0 = arith.constant 0 : index
    %c0_1 = arith.constant 0 : index
    %5 = vector.load %arg2[%c0, %4, %c0_0, %c0_1] : memref<1x18x18x4xf32, #tpu.memory_space<vmem>>, vector<1x8x16x4xf32>
    %6 = vector.shape_cast %5 : vector<1x8x16x4xf32> to vector<8x16x4xf32>
    %7 = vector.shape_cast %6 : vector<8x16x4xf32> to vector<128x4xf32>
    %c0_2 = arith.constant 0 : index
    %c0_3 = arith.constant 0 : index
    %c0_4 = arith.constant 0 : index
    %8 = vector.load %arg3[%c0_2, %c0_3, %c0_4] : memref<9x4x128xf32, #tpu.memory_space<vmem>>, vector<1x4x128xf32>
    %9 = vector.shape_cast %8 : vector<1x4x128xf32> to vector<4x128xf32>
    %cst_5 = arith.constant dense<0.000000e+00> : vector<128x128xf32>
    %10 = tpu.matmul %7, %9, %cst_5 {dimension_numbers = #tpu.dot_dimension_numbers<[1], [0], [0], [1], [0, 0, 1, 1], [], []>} : vector<128x4xf32>, vector<4x128xf32>, vector<128x128xf32> -> vector<128x128xf32>
    %11 = arith.addf %2, %10 : vector<128x128xf32>
    %c0_i32_6 = arith.constant 0 : i32
    %12 = arith.addi %1, %c0_i32_6 : i32
    %c0_7 = arith.constant 0 : index
    %13 = arith.index_cast %12 : i32 to index
    %c1 = arith.constant 1 : index
    %c0_8 = arith.constant 0 : index
    %14 = vector.load %arg2[%c0_7, %13, %c1, %c0_8] : memref<1x18x18x4xf32, #tpu.memory_space<vmem>>, vector<1x8x16x4xf32>
    %15 = vector.shape_cast %14 : vector<1x8x16x4xf32> to vector<8x16x4xf32>
    %16 = vector.shape_cast %15 : vector<8x16x4xf32> to vector<128x4xf32>
    %c1_9 = arith.constant 1 : index
    %c0_10 = arith.constant 0 : index
    %c0_11 = arith.constant 0 : index
    %17 = vector.load %arg3[%c1_9, %c0_10, %c0_11] : memref<9x4x128xf32, #tpu.memory_space<vmem>>, vector<1x4x128xf32>
    %18 = vector.shape_cast %17 : vector<1x4x128xf32> to vector<4x128xf32>
    %cst_12 = arith.constant dense<0.000000e+00> : vector<128x128xf32>
    %19 = tpu.matmul %16, %18, %cst_12 {dimension_numbers = #tpu.dot_dimension_numbers<[1], [0], [0], [1], [0, 0, 1, 1], [], []>} : vector<128x4xf32>, vector<4x128xf32>, vector<128x128xf32> -> vector<128x128xf32>
    %20 = arith.addf %11, %19 : vector<128x128xf32>
    %c0_i32_13 = arith.constant 0 : i32
    %21 = arith.addi %1, %c0_i32_13 : i32
    %c0_14 = arith.constant 0 : index
    %22 = arith.index_cast %21 : i32 to index
    %c2 = arith.constant 2 : index
    %c0_15 = arith.constant 0 : index
    %23 = vector.load %arg2[%c0_14, %22, %c2, %c0_15] : memref<1x18x18x4xf32, #tpu.memory_space<vmem>>, vector<1x8x16x4xf32>
    %24 = vector.shape_cast %23 : vector<1x8x16x4xf32> to vector<8x16x4xf32>
    %25 = vector.shape_cast %24 : vector<8x16x4xf32> to vector<128x4xf32>
    %c2_16 = arith.constant 2 : index
    %c0_17 = arith.constant 0 : index
    %c0_18 = arith.constant 0 : index
    %26 = vector.load %arg3[%c2_16, %c0_17, %c0_18] : memref<9x4x128xf32, #tpu.memory_space<vmem>>, vector<1x4x128xf32>
    %27 = vector.shape_cast %26 : vector<1x4x128xf32> to vector<4x128xf32>
    %cst_19 = arith.constant dense<0.000000e+00> : vector<128x128xf32>
    %28 = tpu.matmul %25, %27, %cst_19 {dimension_numbers = #tpu.dot_dimension_numbers<[1], [0], [0], [1], [0, 0, 1, 1], [], []>} : vector<128x4xf32>, vector<4x128xf32>, vector<128x128xf32> -> vector<128x128xf32>
    %29 = arith.addf %20, %28 : vector<128x128xf32>
    %c1_i32 = arith.constant 1 : i32
    %30 = arith.addi %1, %c1_i32 : i32
    %c0_20 = arith.constant 0 : index
    %31 = arith.index_cast %30 : i32 to index
    %c0_21 = arith.constant 0 : index
    %c0_22 = arith.constant 0 : index
    %32 = vector.load %arg2[%c0_20, %31, %c0_21, %c0_22] : memref<1x18x18x4xf32, #tpu.memory_space<vmem>>, vector<1x8x16x4xf32>
    %33 = vector.shape_cast %32 : vector<1x8x16x4xf32> to vector<8x16x4xf32>
    %34 = vector.shape_cast %33 : vector<8x16x4xf32> to vector<128x4xf32>
    %c3 = arith.constant 3 : index
    %c0_23 = arith.constant 0 : index
    %c0_24 = arith.constant 0 : index
    %35 = vector.load %arg3[%c3, %c0_23, %c0_24] : memref<9x4x128xf32, #tpu.memory_space<vmem>>, vector<1x4x128xf32>
    %36 = vector.shape_cast %35 : vector<1x4x128xf32> to vector<4x128xf32>
    %cst_25 = arith.constant dense<0.000000e+00> : vector<128x128xf32>
    %37 = tpu.matmul %34, %36, %cst_25 {dimension_numbers = #tpu.dot_dimension_numbers<[1], [0], [0], [1], [0, 0, 1, 1], [], []>} : vector<128x4xf32>, vector<4x128xf32>, vector<128x128xf32> -> vector<128x128xf32>
    %38 = arith.addf %29, %37 : vector<128x128xf32>
    %c1_i32_26 = arith.constant 1 : i32
    %39 = arith.addi %1, %c1_i32_26 : i32
    %c0_27 = arith.constant 0 : index
    %40 = arith.index_cast %39 : i32 to index
    %c1_28 = arith.constant 1 : index
    %c0_29 = arith.constant 0 : index
    %41 = vector.load %arg2[%c0_27, %40, %c1_28, %c0_29] : memref<1x18x18x4xf32, #tpu.memory_space<vmem>>, vector<1x8x16x4xf32>
    %42 = vector.shape_cast %41 : vector<1x8x16x4xf32> to vector<8x16x4xf32>
    %43 = vector.shape_cast %42 : vector<8x16x4xf32> to vector<128x4xf32>
    %c4 = arith.constant 4 : index
    %c0_30 = arith.constant 0 : index
    %c0_31 = arith.constant 0 : index
    %44 = vector.load %arg3[%c4, %c0_30, %c0_31] : memref<9x4x128xf32, #tpu.memory_space<vmem>>, vector<1x4x128xf32>
    %45 = vector.shape_cast %44 : vector<1x4x128xf32> to vector<4x128xf32>
    %cst_32 = arith.constant dense<0.000000e+00> : vector<128x128xf32>
    %46 = tpu.matmul %43, %45, %cst_32 {dimension_numbers = #tpu.dot_dimension_numbers<[1], [0], [0], [1], [0, 0, 1, 1], [], []>} : vector<128x4xf32>, vector<4x128xf32>, vector<128x128xf32> -> vector<128x128xf32>
    %47 = arith.addf %38, %46 : vector<128x128xf32>
    %c1_i32_33 = arith.constant 1 : i32
    %48 = arith.addi %1, %c1_i32_33 : i32
    %c0_34 = arith.constant 0 : index
    %49 = arith.index_cast %48 : i32 to index
    %c2_35 = arith.constant 2 : index
    %c0_36 = arith.constant 0 : index
    %50 = vector.load %arg2[%c0_34, %49, %c2_35, %c0_36] : memref<1x18x18x4xf32, #tpu.memory_space<vmem>>, vector<1x8x16x4xf32>
    %51 = vector.shape_cast %50 : vector<1x8x16x4xf32> to vector<8x16x4xf32>
    %52 = vector.shape_cast %51 : vector<8x16x4xf32> to vector<128x4xf32>
    %c5 = arith.constant 5 : index
    %c0_37 = arith.constant 0 : index
    %c0_38 = arith.constant 0 : index
    %53 = vector.load %arg3[%c5, %c0_37, %c0_38] : memref<9x4x128xf32, #tpu.memory_space<vmem>>, vector<1x4x128xf32>
    %54 = vector.shape_cast %53 : vector<1x4x128xf32> to vector<4x128xf32>
    %cst_39 = arith.constant dense<0.000000e+00> : vector<128x128xf32>
    %55 = tpu.matmul %52, %54, %cst_39 {dimension_numbers = #tpu.dot_dimension_numbers<[1], [0], [0], [1], [0, 0, 1, 1], [], []>} : vector<128x4xf32>, vector<4x128xf32>, vector<128x128xf32> -> vector<128x128xf32>
    %56 = arith.addf %47, %55 : vector<128x128xf32>
    %c2_i32 = arith.constant 2 : i32
    %57 = arith.addi %1, %c2_i32 : i32
    %c0_40 = arith.constant 0 : index
    %58 = arith.index_cast %57 : i32 to index
    %c0_41 = arith.constant 0 : index
    %c0_42 = arith.constant 0 : index
    %59 = vector.load %arg2[%c0_40, %58, %c0_41, %c0_42] : memref<1x18x18x4xf32, #tpu.memory_space<vmem>>, vector<1x8x16x4xf32>
    %60 = vector.shape_cast %59 : vector<1x8x16x4xf32> to vector<8x16x4xf32>
    %61 = vector.shape_cast %60 : vector<8x16x4xf32> to vector<128x4xf32>
    %c6 = arith.constant 6 : index
    %c0_43 = arith.constant 0 : index
    %c0_44 = arith.constant 0 : index
    %62 = vector.load %arg3[%c6, %c0_43, %c0_44] : memref<9x4x128xf32, #tpu.memory_space<vmem>>, vector<1x4x128xf32>
    %63 = vector.shape_cast %62 : vector<1x4x128xf32> to vector<4x128xf32>
    %cst_45 = arith.constant dense<0.000000e+00> : vector<128x128xf32>
    %64 = tpu.matmul %61, %63, %cst_45 {dimension_numbers = #tpu.dot_dimension_numbers<[1], [0], [0], [1], [0, 0, 1, 1], [], []>} : vector<128x4xf32>, vector<4x128xf32>, vector<128x128xf32> -> vector<128x128xf32>
    %65 = arith.addf %56, %64 : vector<128x128xf32>
    %c2_i32_46 = arith.constant 2 : i32
    %66 = arith.addi %1, %c2_i32_46 : i32
    %c0_47 = arith.constant 0 : index
    %67 = arith.index_cast %66 : i32 to index
    %c1_48 = arith.constant 1 : index
    %c0_49 = arith.constant 0 : index
    %68 = vector.load %arg2[%c0_47, %67, %c1_48, %c0_49] : memref<1x18x18x4xf32, #tpu.memory_space<vmem>>, vector<1x8x16x4xf32>
    %69 = vector.shape_cast %68 : vector<1x8x16x4xf32> to vector<8x16x4xf32>
    %70 = vector.shape_cast %69 : vector<8x16x4xf32> to vector<128x4xf32>
    %c7 = arith.constant 7 : index
    %c0_50 = arith.constant 0 : index
    %c0_51 = arith.constant 0 : index
    %71 = vector.load %arg3[%c7, %c0_50, %c0_51] : memref<9x4x128xf32, #tpu.memory_space<vmem>>, vector<1x4x128xf32>
    %72 = vector.shape_cast %71 : vector<1x4x128xf32> to vector<4x128xf32>
    %cst_52 = arith.constant dense<0.000000e+00> : vector<128x128xf32>
    %73 = tpu.matmul %70, %72, %cst_52 {dimension_numbers = #tpu.dot_dimension_numbers<[1], [0], [0], [1], [0, 0, 1, 1], [], []>} : vector<128x4xf32>, vector<4x128xf32>, vector<128x128xf32> -> vector<128x128xf32>
    %74 = arith.addf %65, %73 : vector<128x128xf32>
    %c2_i32_53 = arith.constant 2 : i32
    %75 = arith.addi %1, %c2_i32_53 : i32
    %c0_54 = arith.constant 0 : index
    %76 = arith.index_cast %75 : i32 to index
    %c2_55 = arith.constant 2 : index
    %c0_56 = arith.constant 0 : index
    %77 = vector.load %arg2[%c0_54, %76, %c2_55, %c0_56] : memref<1x18x18x4xf32, #tpu.memory_space<vmem>>, vector<1x8x16x4xf32>
    %78 = vector.shape_cast %77 : vector<1x8x16x4xf32> to vector<8x16x4xf32>
    %79 = vector.shape_cast %78 : vector<8x16x4xf32> to vector<128x4xf32>
    %c8 = arith.constant 8 : index
    %c0_57 = arith.constant 0 : index
    %c0_58 = arith.constant 0 : index
    %80 = vector.load %arg3[%c8, %c0_57, %c0_58] : memref<9x4x128xf32, #tpu.memory_space<vmem>>, vector<1x4x128xf32>
    %81 = vector.shape_cast %80 : vector<1x4x128xf32> to vector<4x128xf32>
    %cst_59 = arith.constant dense<0.000000e+00> : vector<128x128xf32>
    %82 = tpu.matmul %79, %81, %cst_59 {dimension_numbers = #tpu.dot_dimension_numbers<[1], [0], [0], [1], [0, 0, 1, 1], [], []>} : vector<128x4xf32>, vector<4x128xf32>, vector<128x128xf32> -> vector<128x128xf32>
    %83 = arith.addf %74, %82 : vector<128x128xf32>
    %c0_60 = arith.constant 0 : index
    %c0_61 = arith.constant 0 : index
    %84 = vector.load %arg4[%c0_60, %c0_61] : memref<1x128xf32, #tpu.memory_space<vmem>>, vector<1x128xf32>
    %85 = vector.broadcast %84 : vector<1x128xf32> to vector<128x128xf32>
    %86 = arith.mulf %83, %85 : vector<128x128xf32>
    %c0_62 = arith.constant 0 : index
    %c0_63 = arith.constant 0 : index
    %87 = vector.load %arg5[%c0_62, %c0_63] : memref<1x128xf32, #tpu.memory_space<vmem>>, vector<1x128xf32>
    %88 = vector.broadcast %87 : vector<1x128xf32> to vector<128x128xf32>
    %89 = arith.addf %86, %88 : vector<128x128xf32>
    %cst_64 = arith.constant 0.000000e+00 : f32
    %90 = vector.broadcast %cst_64 : f32 to vector<128x128xf32>
    %91 = arith.maximumf %89, %90 : vector<128x128xf32>
    %92 = vector.shape_cast %91 : vector<128x128xf32> to vector<8x16x128xf32>
    %c0_65 = arith.constant 0 : index
    %c0_66 = arith.constant 0 : index
    %c0_67 = arith.constant 0 : index
    %c0_68 = arith.constant 0 : index
    %93 = vector.load %arg6[%c0_65, %c0_66, %c0_67, %c0_68] : memref<1x8x16x128xf32, #tpu.memory_space<vmem>>, vector<1x8x16x128xf32>
    %94 = vector.shape_cast %93 : vector<1x8x16x128xf32> to vector<8x16x128xf32>
    %95 = vector.shape_cast %92 : vector<8x16x128xf32> to vector<1x8x16x128xf32>
    tpu.vector_store %arg6[%c0_65, %c0_66, %c0_67, %c0_68], %95 {strides = array<i32>} : memref<1x8x16x128xf32, #tpu.memory_space<vmem>>, vector<1x8x16x128xf32>,
    return
  }
  func.func @transform_0(%arg0: i32, %arg1: i32) -> (i32, i32, i32, i32) {
    %c0_i32 = arith.constant 0 : i32
    %c0_i32_0 = arith.constant 0 : i32
    %c0_i32_1 = arith.constant 0 : i32
    %c0_i32_2 = arith.constant 0 : i32
    return %arg0, %c0_i32, %c0_i32_0, %c0_i32_1 : i32, i32, i32, i32
  }
  func.func @transform_1(%arg0: i32, %arg1: i32) -> (i32, i32, i32) {
    %c0_i32 = arith.constant 0 : i32
    %c0_i32_0 = arith.constant 0 : i32
    %c0_i32_1 = arith.constant 0 : i32
    %c0_i32_2 = arith.constant 0 : i32
    return %c0_i32, %c0_i32_0, %c0_i32_1 : i32, i32, i32
  }
  func.func @transform_2(%arg0: i32, %arg1: i32) -> (i32, i32) {
    %c0_i32 = arith.constant 0 : i32
    %c0_i32_0 = arith.constant 0 : i32
    %c0_i32_1 = arith.constant 0 : i32
    return %c0_i32, %c0_i32_0 : i32, i32
  }
  func.func @transform_3(%arg0: i32, %arg1: i32) -> (i32, i32) {
    %c0_i32 = arith.constant 0 : i32
    %c0_i32_0 = arith.constant 0 : i32
    %c0_i32_1 = arith.constant 0 : i32
    return %c0_i32, %c0_i32_0 : i32, i32
  }
  func.func @transform_4(%arg0: i32, %arg1: i32) -> (i32, i32, i32, i32) {
    %c0_i32 = arith.constant 0 : i32
    %c0_i32_0 = arith.constant 0 : i32
    %c0_i32_1 = arith.constant 0 : i32
    return %arg0, %arg1, %c0_i32, %c0_i32_0 : i32, i32, i32, i32
  }
}

</mosaic_0001>

<bundles_post_ra>
// kernel: conv_block_forward.2
= control target key start
LH: loop header
LB: loop body
LE: loop exit
PB: predicated region body
PF: predicated region fallthrough
CT: control target
= control target key end

     0   :  { %s3487_s12 = smov 0   ;;  %s3489_s13 = smov 0   ;;  %s4082_s0 = inlined_call_operand.vmem [shape: f32[2,18,18,4], index: 0, kind: input, shape index: {}]   ;;  %s4083_s1 = inlined_call_operand.vmem [shape: f32[9,4,128], index: 1, kind: input, shape index: {}]   ;;  %s4084_s2 = inlined_call_operand.vmem [shape: f32[1,128], index: 2, kind: output, shape index: {0}]   ;;  %s4085_s3 = inlined_call_operand.vmem [shape: f32[1,128], index: 3, kind: output, shape index: {1}]  }
   0x1   :  { %s3491_s14 = smov 0   ;;  %s3493_s15 = smov 0  }
   0x2   :  { %s3495_s16 = smov 0  }
   0x3 LB: > { %s23_s17 = sadd.s32 1, %s3452_s14  ;;  %s26_s18 = sadd.s32 1, %s3456_s15  ;;  %s3460_s16 = sphi %s3495_s16, %s14_s16   ;;  %s3456_s15 = sphi %s3493_s15, %s4089_s15   ;;  %s3452_s14 = sphi %s3491_s14, %s4088_s14   ;;  %s3448_s13 = sphi %s3489_s13, %s4087_s13   ;;  %s3444_s12 = sphi %s3487_s12, %s4086_s12  }
   0x4   : > { %p24_p0 = scmp.ge.s32.totalorder %s23_s17, 2  ;;  %p2442_p1 = scmp.ge.s32.totalorder %s3460_s16, 1 }
   0x5   : > { %p142_p2 = scmp.lt.s32.totalorder %s3460_s16, 5 }
   0x6   : > { %s4091_s17 = smov (%p24_p0, %s23_s17), 0  ;;  %s4093_s18 = smov (!%p24_p0, %s26_s18), %s3456_s15 }
   0x7   : > { %p143_p3 = pnand %p2442_p1, %p142_p2  ;;  %p28_p4 = scmp.ge.s32.totalorder %s4093_s18, 2 }
   0x8   : > { %p161_p5 = scmp.lt.s32.totalorder (!%p143_p3), %s3448_s13, 1  ;;  %p166_p6 = scmp.eq.s32.totalorder (!%p143_p3), %s3448_s13, 0 }
   0x9   : > { %s4095_s18 = smov (%p28_p4, %s4093_s18), 0  ;;  %146 = sbr.rel (%p143_p3) target bundleno = 651 (0x28b), region = 28 }
   0xa   : > { %p167_p7 = scmp.eq.s32.totalorder (!%p143_p3), %s3444_s12, 0 }
   0xc   : > { %p168_p8 = pnand (!%p143_p3), %p167_p7, %p166_p6 }
  0x10   : > { %s4097_s13 = smov (!%p161_p5, %s3448_s13), 1  ;;  %171 = sbr.rel (%p168_p8) target bundleno = 23 (0x17), region = 32 }
  0x11   : > { %s3376_s19 = smul.u32 432, %s4097_s13  ;;  %v3462_v0 = vmov (!%p168_p8), 0.0  }
  0x12   : > { %172 = vst [vmem:[%s4084_s2] sm:$0x1] (!%p168_p8), %v3462_v0  ;;  %173 = vst [vmem:[%s4085_s3] sm:$0x1] (!%p168_p8), %v3462_v0 }
  0x13   : > { %s165_s22 = scalar_lea.vmem %s4082_s0, %s3376_s19 }
  0x17 PF: > { %vm261_vm0 = vcmask 1043456   ;;  %v2551_v1 = vld [vmem:[%s4083_s1 + $0x10] sm:$0xf]  ;;  %v2446_v2 = vld [vmem:[%s4083_s1 + $0x4] sm:$0xf]  ;;  %s2445_s4 = smul.u32 192, %s3444_s12 }
  0x18   : > { %3000 = vmatprep.subr.msk.mxu0 %vm261_vm0, %v2551_v1  ;;  %2896 = vmatprep.subr.msk.mxu1 %vm261_vm0, %v2446_v2  ;;  %vm212_vm1 = vcmask 31744   ;;  %v2585_v3 = vld [vmem:[%s4083_s1 + $0x14] sm:$0xf]  ;;  %v193_v4 = vld [vmem:[%s4083_s1] sm:$0xf]  ;;  %vm3464_vm2 = vmmov 0  }
  0x19   : > { %3001 = vmatpush3.msk.msra.mxu0 %vm261_vm0, %v2551_v1  ;;  %2897 = vmatpush3.msk.msra.mxu1 %vm261_vm0, %v2446_v2  ;;  %s3546_s9 = scalar_lea.vmem %s165_s22, %s2445_s4  ;;  %v2621_v10 = vld [vmem:[%s4083_s1 + $0x18] sm:$0xf]  ;;  %v3567_v11 = vld [vmem:[%s4083_s1 + $0x8] sm:$0xf]  ;;  %v3690_v31 = vld [vmem:[%s4083_s1 + $0x1c] sm:$0xf] }
  0x1a   : > { %v194_v5 = vld [vmem:[%s3546_s9 + $0x1] sm:$0xff]  ;;  %v2535_v6 = vld [vmem:[%s3546_s9 + $0x19] sm:$0xff]  ;;  %3026 = vmatprep.subr.msk.mxu0 %vm261_vm0, %v2585_v3  ;;  %v195_v7 = vld [vmem:[%s3546_s9 + $0x9] sm:$0xff]  ;;  %2922 = vmatprep.subr.msk.mxu1 %vm261_vm0, %v193_v4 }
  0x1b   : > { %2898 = vmatprep.mubr.msk.f32.mxu1 %vm212_vm1, %v194_v5  ;;  %3002 = vmatprep.mubr.msk.f32.mxu0 %vm212_vm1, %v2535_v6  ;;  %v2536_v8 = vld [vmem:[%s3546_s9 + $0x21] sm:$0xff]  ;;  %v3557_v9 = vld [vmem:[%s3546_s9 + $0x31] sm:$0xff]  ;;  %v3572_v12 = vld [vmem:[%s3546_s9 + $0x39] sm:$0xff] }
  0x1c   : > { %2899 = vmatmul.mubr.msk.f32.vlgmr.msra.gmra.mrb[0].mxu1 %vm212_vm1, %v195_v7  ;;  %3003 = vmatmul.mubr.msk.f32.vlgmr.msra.gmra.mrb[0].mxu0 %vm212_vm1, %v2536_v8  ;;  %v3577_v13 = vld [vmem:[%s3546_s9 + $0x49] sm:$0xff]  ;;  %v3591_v14 = vld [vmem:[%s3546_s9 + $0x51] sm:$0xff]  ;;  %v3594_v15 = vld [vmem:[%s3546_s9 + $0x61] sm:$0xff]  ;;  %v3465_v7 = vmov 0.0  }
  0x1d   : > { %3027 = vmatpush3.msk.msra.mxu0 %vm261_vm0, %v2585_v3  ;;  %2901 = vmatprep.mubr.msk.f32.mxu1 %vm212_vm1, %v2535_v6  ;;  %v3605_v16 = vld [vmem:[%s3546_s9 + $0x69] sm:$0xff]  ;;  %v3608_v17 = vld [vmem:[%s3546_s9 + $0x79] sm:$0xff]  ;;  %v3619_v18 = vld [vmem:[%s3546_s9 + $0x81] sm:$0xff]  ;;  %v3463_v6 = vmov 0.0|0.0  }
  0x1e   : > { %3005 = vmatprep.mubr.msk.f32.mxu0 %vm212_vm1, %v3557_v9  ;;  %2923 = vmatpush3.msk.msra.mxu1 %vm261_vm0, %v193_v4  ;;  %v3622_v19 = vld [vmem:[%s3546_s9 + $0x91] sm:$0xff]  ;;  %v3633_v20 = vld [vmem:[%s3546_s9 + $0x99] sm:$0xff]  ;;  %v3636_v21 = vld [vmem:[%s3546_s9 + $0xa9] sm:$0xff] }
  0x1f   : > { %3052 = vmatprep.subr.msk.mxu0 %vm261_vm0, %v2621_v10  ;;  %2948 = vmatprep.subr.msk.mxu1 %vm261_vm0, %v3567_v11  ;;  %v3647_v22 = vld [vmem:[%s3546_s9 + $0xb1] sm:$0xff]  ;;  %v3650_v23 = vld [vmem:[%s3546_s9 + $0xc1] sm:$0xff]  ;;  %v3661_v24 = vld [vmem:[%s3546_s9 + $0xc9] sm:$0xff] }
  0x20   : > { %2902 = vmatmul.mubr.msk.f32.gmra.mrb[2].mxu1 %vm212_vm1, %v2536_v8  ;;  %3006 = vmatmul.mubr.msk.f32.gmra.mrb[2].mxu0 %vm212_vm1, %v3572_v12  ;;  %v177_v25 = vld [vmem:[%s3546_s9] sm:$0xff]  ;;  %v178_v27 = vld [vmem:[%s3546_s9 + $0x8] sm:$0xff]  ;;  %v3679_v29 = vld [vmem:[%s3546_s9 + $0x18] sm:$0xff] }
  0x21   : > { %2904 = vmatprep.mubr.msk.f32.mxu1 %vm212_vm1, %v3557_v9  ;;  %3008 = vmatprep.mubr.msk.f32.mxu0 %vm212_vm1, %v3577_v13  ;;  %v3665_v26 = vld [vmem:[%s3546_s9 + $0x1a] sm:$0xff]  ;;  %v3676_v28 = vld [vmem:[%s3546_s9 + $0x22] sm:$0xff]  ;;  %v3682_v30 = vld [vmem:[%s3546_s9 + $0x32] sm:$0xff] }
  0x22   : > { %v3695_v32 = vld [vmem:[%s4083_s1 + $0xc] sm:$0xf]  ;;  %v3701_v33 = vld [vmem:[%s3546_s9 + $0x20] sm:$0xff]  ;;  %v3709_v35 = vld [vmem:[%s3546_s9 + $0x30] sm:$0xff] }
  0x23   : > { %v3704_v34 = vld [vmem:[%s3546_s9 + $0x3a] sm:$0xff]  ;;  %v3712_v36 = vld [vmem:[%s3546_s9 + $0x4a] sm:$0xff]  ;;  %v3732_v38 = vld [vmem:[%s3546_s9 + $0x52] sm:$0xff] }
  0x24   : > { %2905 = vmatmul.mubr.msk.f32.gmra.mrb[4].mxu1 %vm212_vm1, %v3572_v12  ;;  %3009 = vmatmul.mubr.msk.f32.gmra.mrb[4].mxu0 %vm212_vm1, %v3591_v14  ;;  %v3729_v37 = vld [vmem:[%s3546_s9 + $0x38] sm:$0xff]  ;;  %v3735_v39 = vld [vmem:[%s3546_s9 + $0x48] sm:$0xff]  ;;  %v3749_v41 = vld [vmem:[%s3546_s9 + $0x50] sm:$0xff] }
  0x25   : > { %2907 = vmatprep.mubr.msk.f32.mxu1 %vm212_vm1, %v3577_v13  ;;  %3011 = vmatprep.mubr.msk.f32.mxu0 %vm212_vm1, %v3594_v15  ;;  %v3738_v40 = vld [vmem:[%s3546_s9 + $0x62] sm:$0xff]  ;;  %v3752_v42 = vld [vmem:[%s3546_s9 + $0x6a] sm:$0xff]  ;;  %v3758_v44 = vld [vmem:[%s3546_s9 + $0x7a] sm:$0xff] }
  0x26   : > { %v3755_v43 = vld [vmem:[%s3546_s9 + $0x60] sm:$0xff]  ;;  %v3769_v45 = vld [vmem:[%s3546_s9 + $0x68] sm:$0xff]  ;;  %v3775_v47 = vld [vmem:[%s3546_s9 + $0x78] sm:$0xff] }
  0x27   : > { %v3772_v46 = vld [vmem:[%s3546_s9 + $0x82] sm:$0xff]  ;;  %v3778_v48 = vld [vmem:[%s3546_s9 + $0x92] sm:$0xff]  ;;  %v3792_v50 = vld [vmem:[%s3546_s9 + $0x9a] sm:$0xff] }
  0x28   : > { %2908 = vmatmul.mubr.msk.f32.gmra.mrb[6].mxu1 %vm212_vm1, %v3591_v14  ;;  %3012 = vmatmul.mubr.msk.f32.gmra.mrb[6].mxu0 %vm212_vm1, %v3605_v16  ;;  %v3789_v49 = vld [vmem:[%s3546_s9 + $0x80] sm:$0xff]  ;;  %v3795_v51 = vld [vmem:[%s3546_s9 + $0x90] sm:$0xff]  ;;  %v3809_v53 = vld [vmem:[%s3546_s9 + $0x98] sm:$0xff] }
  0x29   : > { %2910 = vmatprep.mubr.msk.f32.mxu1 %vm212_vm1, %v3594_v15  ;;  %3014 = vmatprep.mubr.msk.f32.mxu0 %vm212_vm1, %v3608_v17  ;;  %v3798_v52 = vld [vmem:[%s3546_s9 + $0xaa] sm:$0xff]  ;;  %v3812_v54 = vld [vmem:[%s3546_s9 + $0xb2] sm:$0xff]  ;;  %v3818_v56 = vld [vmem:[%s3546_s9 + $0xc2] sm:$0xff] }
  0x2a   : > { %v3815_v55 = vld [vmem:[%s3546_s9 + $0xa8] sm:$0xff]  ;;  %v3829_v57 = vld [vmem:[%s3546_s9 + $0xb0] sm:$0xff]  ;;  %v2689_v61 = vld [vmem:[%s4083_s1 + $0x20] sm:$0xf] }
  0x2b   : > { %v3832_v58 = vld [vmem:[%s3546_s9 + $0xca] sm:$0xff]  ;;  %v606_v59 = vld [vmem:[%s3546_s9 + $0x2] sm:$0xff]  ;;  %v2619_v0 = vld [vmem:[%s3546_s9 + $0xd8] sm:$0xff] }
  0x2c   : > { %2911 = vmatmul.mubr.msk.f32.gmra.mrb[8].mxu1 %vm212_vm1, %v3605_v16  ;;  %3015 = vmatmul.mubr.msk.f32.gmra.mrb[8].mxu0 %vm212_vm1, %v3619_v18  ;;  %v607_v60 = vld [vmem:[%s3546_s9 + $0xa] sm:$0xff]  ;;  %v2617_v62 = vld [vmem:[%s3546_s9 + $0xc0] sm:$0xff] }
  0x2d   : > { %2913 = vmatprep.mubr.msk.f32.mxu1 %vm212_vm1, %v3608_v17  ;;  %3017 = vmatprep.mubr.msk.f32.mxu0 %vm212_vm1, %v3622_v19  ;;  %v2618_v63 = vld [vmem:[%s3546_s9 + $0xc8] sm:$0xff]  ;;  %v2620_v1 = vld [vmem:[%s3546_s9 + $0xe0] sm:$0xff] }
  0x2e   : > { %v2653_v2 = vld [vmem:[%s3546_s9 + $0xd9] sm:$0xff]  ;;  %v2654_v3 = vld [vmem:[%s3546_s9 + $0xe1] sm:$0xff] }
  0x2f   : > { %v2687_v4 = vld [vmem:[%s3546_s9 + $0xda] sm:$0xff]  ;;  %v2688_v5 = vld [vmem:[%s3546_s9 + $0xe2] sm:$0xff] }
  0x30   : > { %2914 = vmatmul.mubr.msk.f32.gmra.mrb[10].mxu1 %vm212_vm1, %v3619_v18  ;;  %3018 = vmatmul.mubr.msk.f32.gmra.mrb[10].mxu0 %vm212_vm1, %v3633_v20 }
  0x31   : > { %2916 = vmatprep.mubr.msk.f32.mxu1 %vm212_vm1, %v3622_v19  ;;  %3020 = vmatprep.mubr.msk.f32.mxu0 %vm212_vm1, %v3636_v21 }
  0x34   : > { %2917 = vmatmul.mubr.msk.f32.gmra.mrb[12].mxu1 %vm212_vm1, %v3633_v20  ;;  %3021 = vmatmul.mubr.msk.f32.gmra.mrb[12].mxu0 %vm212_vm1, %v3647_v22 }
  0x35   : > { %2919 = vmatprep.mubr.msk.f32.mxu1 %vm212_vm1, %v3636_v21  ;;  %3023 = vmatprep.mubr.msk.f32.mxu0 %vm212_vm1, %v3650_v23 }
  0x38   : > { %2920 = vmatmul.mubr.msk.f32.gmra.mrb[14].mxu1 %vm212_vm1, %v3647_v22  ;;  %3024 = vmatmul.mubr.msk.f32.gmra.mrb[14].mxu0 %vm212_vm1, %v3661_v24 }
  0x39   : > { %2924 = vmatprep.mubr.msk.f32.mxu1 %vm212_vm1, %v177_v25  ;;  %3028 = vmatprep.mubr.msk.f32.mxu0 %vm212_vm1, %v3665_v26 }
  0x3c   : > { %2925 = vmatmul.mubr.msk.f32.vlgmr.msra.gmra.mrb[0].mxu1 %vm212_vm1, %v178_v27  ;;  %3029 = vmatmul.mubr.msk.f32.vlgmr.msra.gmra.mrb[0].mxu0 %vm212_vm1, %v3676_v28 }
  0x3d   : > { %3053 = vmatpush3.msk.msra.mxu0 %vm261_vm0, %v2621_v10  ;;  %2927 = vmatprep.mubr.msk.f32.mxu1 %vm212_vm1, %v3679_v29 }
  0x3e   : > { %3031 = vmatprep.mubr.msk.f32.mxu0 %vm212_vm1, %v3682_v30  ;;  %2949 = vmatpush3.msk.msra.mxu1 %vm261_vm0, %v3567_v11 }
  0x3f   : > { %3078 = vmatprep.subr.msk.mxu0 %vm261_vm0, %v3690_v31  ;;  %2974 = vmatprep.subr.msk.mxu1 %vm261_vm0, %v3695_v32 }
  0x40   : > { %2928 = vmatmul.mubr.msk.f32.gmra.mrb[2].mxu1 %vm212_vm1, %v3701_v33  ;;  %3032 = vmatmul.mubr.msk.f32.gmra.mrb[2].mxu0 %vm212_vm1, %v3704_v34 }
  0x41   : > { %2930 = vmatprep.mubr.msk.f32.mxu1 %vm212_vm1, %v3709_v35  ;;  %3034 = vmatprep.mubr.msk.f32.mxu0 %vm212_vm1, %v3712_v36 }
  0x44   : > { %2931 = vmatmul.mubr.msk.f32.gmra.mrb[4].mxu1 %vm212_vm1, %v3729_v37  ;;  %3035 = vmatmul.mubr.msk.f32.gmra.mrb[4].mxu0 %vm212_vm1, %v3732_v38 }
  0x45   : > { %2933 = vmatprep.mubr.msk.f32.mxu1 %vm212_vm1, %v3735_v39  ;;  %3037 = vmatprep.mubr.msk.f32.mxu0 %vm212_vm1, %v3738_v40 }
  0x48   : > { %2934 = vmatmul.mubr.msk.f32.gmra.mrb[6].mxu1 %vm212_vm1, %v3749_v41  ;;  %3038 = vmatmul.mubr.msk.f32.gmra.mrb[6].mxu0 %vm212_vm1, %v3752_v42 }
  0x49   : > { %2936 = vmatprep.mubr.msk.f32.mxu1 %vm212_vm1, %v3755_v43  ;;  %3040 = vmatprep.mubr.msk.f32.mxu0 %vm212_vm1, %v3758_v44 }
  0x4c   : > { %2937 = vmatmul.mubr.msk.f32.gmra.mrb[8].mxu1 %vm212_vm1, %v3769_v45  ;;  %3041 = vmatmul.mubr.msk.f32.gmra.mrb[8].mxu0 %vm212_vm1, %v3772_v46 }
  0x4d   : > { %2939 = vmatprep.mubr.msk.f32.mxu1 %vm212_vm1, %v3775_v47  ;;  %3043 = vmatprep.mubr.msk.f32.mxu0 %vm212_vm1, %v3778_v48 }
  0x50   : > { %2940 = vmatmul.mubr.msk.f32.gmra.mrb[10].mxu1 %vm212_vm1, %v3789_v49  ;;  %3044 = vmatmul.mubr.msk.f32.gmra.mrb[10].mxu0 %vm212_vm1, %v3792_v50 }
  0x51   : > { %2942 = vmatprep.mubr.msk.f32.mxu1 %vm212_vm1, %v3795_v51  ;;  %3046 = vmatprep.mubr.msk.f32.mxu0 %vm212_vm1, %v3798_v52 }
  0x54   : > { %2943 = vmatmul.mubr.msk.f32.gmra.mrb[12].mxu1 %vm212_vm1, %v3809_v53  ;;  %3047 = vmatmul.mubr.msk.f32.gmra.mrb[12].mxu0 %vm212_vm1, %v3812_v54 }
  0x55   : > { %2945 = vmatprep.mubr.msk.f32.mxu1 %vm212_vm1, %v3815_v55  ;;  %3049 = vmatprep.mubr.msk.f32.mxu0 %vm212_vm1, %v3818_v56 }
  0x58   : > { %2946 = vmatmul.mubr.msk.f32.gmra.mrb[14].mxu1 %vm212_vm1, %v3829_v57  ;;  %3050 = vmatmul.mubr.msk.f32.gmra.mrb[14].mxu0 %vm212_vm1, %v3832_v58 }
  0x59   : > { %2950 = vmatprep.mubr.msk.f32.mxu1 %vm212_vm1, %v606_v59  ;;  %3054 = vmatprep.mubr.msk.f32.mxu0 %vm212_vm1, %v3709_v35 }
  0x5c   : > { %2951 = vmatmul.mubr.msk.f32.vlgmr.msra.gmra.mrb[0].mxu1 %vm212_vm1, %v607_v60  ;;  %3055 = vmatmul.mubr.msk.f32.vlgmr.msra.gmra.mrb[0].mxu0 %vm212_vm1, %v3729_v37 }
  0x5d   : > { %3079 = vmatpush3.msk.msra.mxu0 %vm261_vm0, %v3690_v31  ;;  %2953 = vmatprep.mubr.msk.f32.mxu1 %vm212_vm1, %v3665_v26 }
  0x5e   : > { %3057 = vmatprep.mubr.msk.f32.mxu0 %vm212_vm1, %v3735_v39  ;;  %2975 = vmatpush3.msk.msra.mxu1 %vm261_vm0, %v3695_v32 }
  0x5f   : > { %3104 = vmatprep.subr.msk.mxu0 %vm261_vm0, %v2689_v61  ;;  %3200 = vmatprep.subr.bf16.mxu1 %v3463_v6 }
  0x60   : > { %2954 = vmatmul.mubr.msk.f32.gmra.mrb[2].mxu1 %vm212_vm1, %v3676_v28  ;;  %3058 = vmatmul.mubr.msk.f32.gmra.mrb[2].mxu0 %vm212_vm1, %v3749_v41 }
  0x61   : > { %2956 = vmatprep.mubr.msk.f32.mxu1 %vm212_vm1, %v3682_v30  ;;  %3060 = vmatprep.mubr.msk.f32.mxu0 %vm212_vm1, %v3755_v43 }
  0x64   : > { %2957 = vmatmul.mubr.msk.f32.gmra.mrb[4].mxu1 %vm212_vm1, %v3704_v34  ;;  %3061 = vmatmul.mubr.msk.f32.gmra.mrb[4].mxu0 %vm212_vm1, %v3769_v45 }
  0x65   : > { %2959 = vmatprep.mubr.msk.f32.mxu1 %vm212_vm1, %v3712_v36  ;;  %3063 = vmatprep.mubr.msk.f32.mxu0 %vm212_vm1, %v3775_v47 }
  0x68   : > { %2960 = vmatmul.mubr.msk.f32.gmra.mrb[6].mxu1 %vm212_vm1, %v3732_v38  ;;  %3064 = vmatmul.mubr.msk.f32.gmra.mrb[6].mxu0 %vm212_vm1, %v3789_v49 }
  0x69   : > { %2962 = vmatprep.mubr.msk.f32.mxu1 %vm212_vm1, %v3738_v40  ;;  %3066 = vmatprep.mubr.msk.f32.mxu0 %vm212_vm1, %v3795_v51 }
  0x6c   : > { %2963 = vmatmul.mubr.msk.f32.gmra.mrb[8].mxu1 %vm212_vm1, %v3752_v42  ;;  %3067 = vmatmul.mubr.msk.f32.gmra.mrb[8].mxu0 %vm212_vm1, %v3809_v53 }
  0x6d   : > { %2965 = vmatprep.mubr.msk.f32.mxu1 %vm212_vm1, %v3758_v44  ;;  %3069 = vmatprep.mubr.msk.f32.mxu0 %vm212_vm1, %v3815_v55 }
  0x70   : > { %2966 = vmatmul.mubr.msk.f32.gmra.mrb[10].mxu1 %vm212_vm1, %v3772_v46  ;;  %3070 = vmatmul.mubr.msk.f32.gmra.mrb[10].mxu0 %vm212_vm1, %v3829_v57 }
  0x71   : > { %2968 = vmatprep.mubr.msk.f32.mxu1 %vm212_vm1, %v3778_v48  ;;  %3072 = vmatprep.mubr.msk.f32.mxu0 %vm212_vm1, %v2617_v62 }
  0x74   : > { %2969 = vmatmul.mubr.msk.f32.gmra.mrb[12].mxu1 %vm212_vm1, %v3792_v50  ;;  %3073 = vmatmul.mubr.msk.f32.gmra.mrb[12].mxu0 %vm212_vm1, %v2618_v63 }
  0x75   : > { %2971 = vmatprep.mubr.msk.f32.mxu1 %vm212_vm1, %v3798_v52  ;;  %3075 = vmatprep.mubr.msk.f32.mxu0 %vm212_vm1, %v2619_v0 }
  0x78   : > { %2972 = vmatmul.mubr.msk.f32.gmra.mrb[14].mxu1 %vm212_vm1, %v3812_v54  ;;  %3076 = vmatmul.mubr.msk.f32.gmra.mrb[14].mxu0 %vm212_vm1, %v2620_v1 }
  0x79   : > { %2976 = vmatprep.mubr.msk.f32.mxu1 %vm212_vm1, %v3679_v29  ;;  %3080 = vmatprep.mubr.msk.f32.mxu0 %vm212_vm1, %v3557_v9 }
  0x7c   : > { %2977 = vmatmul.mubr.msk.f32.vlgmr.msra.gmra.mrb[0].mxu1 %vm212_vm1, %v3701_v33  ;;  %3081 = vmatmul.mubr.msk.f32.vlgmr.msra.gmra.mrb[0].mxu0 %vm212_vm1, %v3572_v12 }
  0x7d   : > { %3105 = vmatpush3.msk.msra.mxu0 %vm261_vm0, %v2689_v61  ;;  %2979 = vmatprep.mubr.msk.f32.mxu1 %vm212_vm1, %v3709_v35 }
  0x7e   : > { %3083 = vmatprep.mubr.msk.f32.mxu0 %vm212_vm1, %v3577_v13 }
  0x80   : > { %2980 = vmatmul.mubr.msk.f32.gmra.mrb[2].mxu1 %vm212_vm1, %v3729_v37  ;;  %3084 = vmatmul.mubr.msk.f32.gmra.mrb[2].mxu0 %vm212_vm1, %v3591_v14 }
  0x81   : > { %2982 = vmatprep.mubr.msk.f32.mxu1 %vm212_vm1, %v3735_v39  ;;  %3086 = vmatprep.mubr.msk.f32.mxu0 %vm212_vm1, %v3594_v15 }
  0x84   : > { %2983 = vmatmul.mubr.msk.f32.gmra.mrb[4].mxu1 %vm212_vm1, %v3749_v41  ;;  %3087 = vmatmul.mubr.msk.f32.gmra.mrb[4].mxu0 %vm212_vm1, %v3605_v16 }
  0x85   : > { %2985 = vmatprep.mubr.msk.f32.mxu1 %vm212_vm1, %v3755_v43  ;;  %3089 = vmatprep.mubr.msk.f32.mxu0 %vm212_vm1, %v3608_v17 }
  0x88   : > { %2986 = vmatmul.mubr.msk.f32.gmra.mrb[6].mxu1 %vm212_vm1, %v3769_v45  ;;  %3090 = vmatmul.mubr.msk.f32.gmra.mrb[6].mxu0 %vm212_vm1, %v3619_v18 }
  0x89   : > { %2988 = vmatprep.mubr.msk.f32.mxu1 %vm212_vm1, %v3775_v47  ;;  %3092 = vmatprep.mubr.msk.f32.mxu0 %vm212_vm1, %v3622_v19 }
  0x8c   : > { %2989 = vmatmul.mubr.msk.f32.gmra.mrb[8].mxu1 %vm212_vm1, %v3789_v49  ;;  %3093 = vmatmul.mubr.msk.f32.gmra.mrb[8].mxu0 %vm212_vm1, %v3633_v20 }
  0x8d   : > { %2991 = vmatprep.mubr.msk.f32.mxu1 %vm212_vm1, %v3795_v51  ;;  %3095 = vmatprep.mubr.msk.f32.mxu0 %vm212_vm1, %v3636_v21 }
  0x90   : > { %2992 = vmatmul.mubr.msk.f32.gmra.mrb[10].mxu1 %vm212_vm1, %v3809_v53  ;;  %3096 = vmatmul.mubr.msk.f32.gmra.mrb[10].mxu0 %vm212_vm1, %v3647_v22 }
  0x91   : > { %2994 = vmatprep.mubr.msk.f32.mxu1 %vm212_vm1, %v3815_v55  ;;  %3098 = vmatprep.mubr.msk.f32.mxu0 %vm212_vm1, %v3650_v23 }
  0x94   : > { %2995 = vmatmul.mubr.msk.f32.gmra.mrb[12].mxu1 %vm212_vm1, %v3829_v57  ;;  %3099 = vmatmul.mubr.msk.f32.gmra.mrb[12].mxu0 %vm212_vm1, %v3661_v24 }
  0x95   : > { %2997 = vmatprep.mubr.msk.f32.mxu1 %vm212_vm1, %v2617_v62  ;;  %3101 = vmatprep.mubr.msk.f32.mxu0 %vm212_vm1, %v2653_v2 }
  0x98   : > { %2998 = vmatmul.mubr.msk.f32.gmra.mrb[14].mxu1 %vm212_vm1, %v2618_v63  ;;  %3102 = vmatmul.mubr.msk.f32.gmra.mrb[14].mxu0 %vm212_vm1, %v2654_v3 }
  0x99   : > { %3106 = vmatprep.mubr.msk.f32.mxu0 %vm212_vm1, %v3682_v30  ;;  %3162 = vmatprep.mubr.msk.f32.mxu1 %vm3464_vm2, %v3465_v7 }
  0x9c   : > { %3107 = vmatmul.mubr.msk.f32.vlgmr.msra.gmra.mrb[0].mxu0 %vm212_vm1, %v3704_v34 }
  0x9d   : > { %3109 = vmatprep.mubr.msk.f32.mxu0 %vm212_vm1, %v3712_v36 }
  0xa0   : > { %3110 = vmatmul.mubr.msk.f32.gmra.mrb[2].mxu0 %vm212_vm1, %v3732_v38 }
  0xa1   : > { %3112 = vmatprep.mubr.msk.f32.mxu0 %vm212_vm1, %v3738_v40 }
  0xa4   : > { %3113 = vmatmul.mubr.msk.f32.gmra.mrb[4].mxu0 %vm212_vm1, %v3752_v42 }
  0xa5   : > { %3115 = vmatprep.mubr.msk.f32.mxu0 %vm212_vm1, %v3758_v44 }
  0xa8   : > { %3116 = vmatmul.mubr.msk.f32.gmra.mrb[6].mxu0 %vm212_vm1, %v3772_v46 }
  0xa9   : > { %3118 = vmatprep.mubr.msk.f32.mxu0 %vm212_vm1, %v3778_v48 }
  0xac   : > { %3119 = vmatmul.mubr.msk.f32.gmra.mrb[8].mxu0 %vm212_vm1, %v3792_v50 }
  0xad   : > { %3121 = vmatprep.mubr.msk.f32.mxu0 %vm212_vm1, %v3798_v52 }
  0xb0   : > { %3122 = vmatmul.mubr.msk.f32.gmra.mrb[10].mxu0 %vm212_vm1, %v3812_v54 }
  0xb1   : > { %3124 = vmatprep.mubr.msk.f32.mxu0 %vm212_vm1, %v3818_v56 }
  0xb4   : > { %3125 = vmatmul.mubr.msk.f32.gmra.mrb[12].mxu0 %vm212_vm1, %v3832_v58 }
  0xb5   : > { %3127 = vmatprep.mubr.msk.f32.mxu0 %vm212_vm1, %v2687_v4 }
  0xb8   : > { %3128 = vmatmul.mubr.msk.f32.gmra.mrb[14].mxu0 %vm212_vm1, %v2688_v5 }
 0x14f   : > { %v2978_v8 = vpop.f32.mrb[0].mxu1 }
 0x150   : > { %v974_v9 = vpop.f32.mrb[1].mxu1 }
 0x153   : > { %v2981_v10 = vpop.f32.mrb[2].mxu1 }
 0x154   : > { %v984_v11 = vpop.f32.mrb[3].mxu1 }
 0x157   : > { %v2984_v12 = vpop.f32.mrb[4].mxu1 }
 0x158   : > { %v994_v13 = vpop.f32.mrb[5].mxu1 }
 0x15b   : > { %v2987_v14 = vpop.f32.mrb[6].mxu1 }
 0x15c   : > { %v1004_v15 = vpop.f32.mrb[7].mxu1 }
 0x15f   : > { %v2990_v16 = vpop.f32.mrb[8].mxu1 }
 0x160   : > { %v1014_v17 = vpop.f32.mrb[9].mxu1 }
 0x163   : > { %v2993_v18 = vpop.f32.mrb[10].mxu1 }
 0x164   : > { %v1024_v19 = vpop.f32.mrb[11].mxu1 }
 0x167   : > { %v2996_v20 = vpop.f32.mrb[12].mxu1 }
 0x168   : > { %v4008_v21 = vpop.f32.mrb[13].mxu1 }
 0x16b   : > { %v4010_v22 = vpop.f32.mrb[14].mxu1 }
 0x16c   : > { %v4012_v23 = vpop.f32.mrb[15].mxu1 }
 0x16f   : > { %v3108_v24 = vpop.f32.mrb[0].mxu0 }
 0x170   : > { %v3248_v25 = vadd.f32 %v3108_v24, %v2978_v8  ;;  %v2127_v26 = vpop.f32.mrb[1].mxu0 }
 0x171   : > { %v3249_v27 = vadd.f32 %v2127_v26, %v974_v9 }
 0x172   : > { %v4014_v28 = vmul.f32 %v3248_v25, %v3248_v25 }
 0x173   : > { %v3201_v29 = vpack.c.bf16 %v3248_v25, %v3249_v27  ;;  %v4016_v30 = vmul.f32 %v3249_v27, %v3249_v27  ;;  %v3111_v31 = vpop.f32.mrb[2].mxu0 }
 0x174   : > { %v3250_v32 = vadd.f32 %v3111_v31, %v2981_v10  ;;  %v2137_v33 = vpop.f32.mrb[3].mxu0 }
 0x175   : > { %v3225_v34 = vpack.c.bf16 %v4014_v28, %v4016_v30  ;;  %v3251_v35 = vadd.f32 %v2137_v33, %v984_v11  ;;  %3202 = vmatpush3.bf16.msra.mxu1 %v3201_v29  ;;  %v3466_v29 = vmov 1.0   ;;  %v2295_v30 = vld [vmem:[%s4085_s3] sm:$0x1] }
 0x176   : > { %v4020_v36 = vmul.f32 %v3250_v32, %v3250_v32  ;;  %3203 = vmatprep.subr.bf16.mxu1 %v3463_v6 }
 0x177   : > { %v3204_v37 = vpack.c.bf16 %v3250_v32, %v3251_v35  ;;  %v4023_v38 = vmul.f32 %v3251_v35, %v3251_v35  ;;  %v3114_v39 = vpop.f32.mrb[4].mxu0 }
 0x178   : > { %v3252_v40 = vadd.f32 %v3114_v39, %v2984_v12  ;;  %v2147_v41 = vpop.f32.mrb[5].mxu0 }
 0x179   : > { %v3228_v42 = vpack.c.bf16 %v4020_v36, %v4023_v38  ;;  %v3253_v43 = vadd.f32 %v2147_v41, %v994_v13  ;;  %3205 = vmatpush3.bf16.msra.mxu1 %v3204_v37 }
 0x17a   : > { %v4027_v44 = vmul.f32 %v3252_v40, %v3252_v40  ;;  %3206 = vmatprep.subr.bf16.mxu1 %v3463_v6 }
 0x17b   : > { %v3207_v45 = vpack.c.bf16 %v3252_v40, %v3253_v43  ;;  %v2300_v46 = vmul.f32 %v3253_v43, %v3253_v43  ;;  %v3117_v47 = vpop.f32.mrb[6].mxu0 }
 0x17c   : > { %v3254_v48 = vadd.f32 %v3117_v47, %v2987_v14  ;;  %v2157_v49 = vpop.f32.mrb[7].mxu0 }
 0x17d   : > { %v3231_v50 = vpack.c.bf16 %v4027_v44, %v2300_v46  ;;  %v3255_v51 = vadd.f32 %v2157_v49, %v1004_v15  ;;  %3208 = vmatpush3.bf16.msra.mxu1 %v3207_v45 }
 0x17e   : > { %v2303_v52 = vmul.f32 %v3254_v48, %v3254_v48  ;;  %3209 = vmatprep.subr.bf16.mxu1 %v3463_v6 }
 0x17f   : > { %v3210_v53 = vpack.c.bf16 %v3254_v48, %v3255_v51  ;;  %v2302_v54 = vmul.f32 %v3255_v51, %v3255_v51  ;;  %v3120_v55 = vpop.f32.mrb[8].mxu0 }
 0x180   : > { %v3256_v56 = vadd.f32 %v3120_v55, %v2990_v16  ;;  %v2167_v57 = vpop.f32.mrb[9].mxu0 }
 0x181   : > { %v3234_v58 = vpack.c.bf16 %v2303_v52, %v2302_v54  ;;  %v3257_v59 = vadd.f32 %v2167_v57, %v1014_v17  ;;  %3211 = vmatpush3.bf16.msra.mxu1 %v3210_v53 }
 0x182   : > { %v2305_v60 = vmul.f32 %v3256_v56, %v3256_v56  ;;  %3212 = vmatprep.subr.bf16.mxu1 %v3463_v6 }
 0x183   : > { %v3213_v61 = vpack.c.bf16 %v3256_v56, %v3257_v59  ;;  %v2304_v62 = vmul.f32 %v3257_v59, %v3257_v59  ;;  %v3123_v63 = vpop.f32.mrb[10].mxu0 }
 0x184   : > { %v3258_v0 = vadd.f32 %v3123_v63, %v2993_v18  ;;  %v2177_v1 = vpop.f32.mrb[11].mxu0 }
 0x185   : > { %v3237_v2 = vpack.c.bf16 %v2305_v60, %v2304_v62  ;;  %v3259_v3 = vadd.f32 %v2177_v1, %v1024_v19  ;;  %3214 = vmatpush3.bf16.msra.mxu1 %v3213_v61 }
 0x186   : > { %v2307_v4 = vmul.f32 %v3258_v0, %v3258_v0  ;;  %3215 = vmatprep.subr.bf16.mxu1 %v3463_v6 }
 0x187   : > { %v3216_v5 = vpack.c.bf16 %v3258_v0, %v3259_v3  ;;  %v2306_v8 = vmul.f32 %v3259_v3, %v3259_v3  ;;  %v3126_v9 = vpop.f32.mrb[12].mxu0 }
 0x188   : > { %v3260_v10 = vadd.f32 %v3126_v9, %v2996_v20  ;;  %v2187_v11 = vpop.f32.mrb[13].mxu0 }
 0x189   : > { %v3240_v12 = vpack.c.bf16 %v2307_v4, %v2306_v8  ;;  %v3261_v13 = vadd.f32 %v2187_v11, %v4008_v21  ;;  %3217 = vmatpush3.bf16.msra.mxu1 %v3216_v5 }
 0x18a   : > { %v2309_v14 = vmul.f32 %v3260_v10, %v3260_v10  ;;  %3218 = vmatprep.subr.bf16.mxu1 %v3463_v6 }
 0x18b   : > { %v3219_v15 = vpack.c.bf16 %v3260_v10, %v3261_v13  ;;  %v2308_v16 = vmul.f32 %v3261_v13, %v3261_v13  ;;  %v3129_v17 = vpop.f32.mrb[14].mxu0 }
 0x18c   : > { %v3262_v18 = vadd.f32 %v3129_v17, %v4010_v22  ;;  %v2197_v19 = vpop.f32.mrb[15].mxu0 }
 0x18d   : > { %v3243_v24 = vpack.c.bf16 %v2309_v14, %v2308_v16  ;;  %v3263_v25 = vadd.f32 %v2197_v19, %v4012_v23  ;;  %3220 = vmatpush3.bf16.msra.mxu1 %v3219_v15 }
 0x18e   : > { %v2311_v26 = vmul.f32 %v3262_v18, %v3262_v18  ;;  %3221 = vmatprep.subr.bf16.mxu1 %v3463_v6 }
 0x18f   : > { %v3222_v20 = vpack.c.bf16 %v3262_v18, %v3263_v25  ;;  %v2310_v27 = vmul.f32 %v3263_v25, %v3263_v25 }
 0x191   : > { %v3246_v21 = vpack.c.bf16 %v2311_v26, %v2310_v27  ;;  %3223 = vmatpush3.bf16.msra.mxu1 %v3222_v20 }
 0x192   : > { %3224 = vmatprep.subr.bf16.mxu1 %v3463_v6 }
 0x194   : > { %3163 = vmatmul.mubr.f32.vlgmr.msra.gmra.mrb[16].mxu1 %v3466_v29 }
 0x195   : > { %3226 = vmatpush3.bf16.msra.mxu1 %v3225_v34  ;;  %3197 = vmatprep.mubr.msk.f32.mxu1 %vm3464_vm2, %v3465_v7  ;;  %v2222_v7 = vld [vmem:[%s4084_s2] sm:$0x1] }
 0x196   : > { %3227 = vmatprep.subr.bf16.mxu1 %v3463_v6 }
 0x199   : > { %3229 = vmatpush3.bf16.msra.mxu1 %v3228_v42 }
 0x19a   : > { %3230 = vmatprep.subr.bf16.mxu1 %v3463_v6 }
 0x19d   : > { %3232 = vmatpush3.bf16.msra.mxu1 %v3231_v50 }
 0x19e   : > { %3233 = vmatprep.subr.bf16.mxu1 %v3463_v6 }
 0x1a1   : > { %3235 = vmatpush3.bf16.msra.mxu1 %v3234_v58 }
 0x1a2   : > { %3236 = vmatprep.subr.bf16.mxu1 %v3463_v6 }
 0x1a5   : > { %3238 = vmatpush3.bf16.msra.mxu1 %v3237_v2 }
 0x1a6   : > { %3239 = vmatprep.subr.bf16.mxu1 %v3463_v6 }
 0x1a9   : > { %3241 = vmatpush3.bf16.msra.mxu1 %v3240_v12 }
 0x1aa   : > { %3242 = vmatprep.subr.bf16.mxu1 %v3463_v6 }
 0x1ad   : > { %3244 = vmatpush3.bf16.msra.mxu1 %v3243_v24 }
 0x1ae   : > { %3245 = vmatprep.subr.bf16.mxu1 %v3463_v6 }
 0x1b1   : > { %3247 = vmatpush3.bf16.msra.mxu1 %v3246_v21 }
 0x1b4   : > { %3198 = vmatmul.mubr.f32.vlgmr.msra.gmra.mrb[18].mxu1 %v3466_v29 }
 0x267   : > { %v2289_v22 = vpop.f32.mrb[16].mxu1 }
 0x268   : > { %v2293_v23 = vadd.f32 %v2289_v22, %v2222_v7  ;;  %v3164_v28 = vpop.f32.mrb[17].mxu1 }
 0x26a   : > { %2294 = vst [vmem:[%s4084_s2] sm:$0x1] %v2293_v23 }
 0x287   : > { %v2378_v31 = vpop.f32.mrb[18].mxu1 }
 0x288   : > { %v2382_v32 = vadd.f32 %v2378_v31, %v2295_v30  ;;  %v3199_v6 = vpop.f32.mrb[19].mxu1 }
 0x28a   : > { %2383 = vst [vmem:[%s4085_s3] sm:$0x1] %v2382_v32 }
 0x28b PF: > { %s14_s16 = sadd.s32 1, %s3460_s16   ;;  %s4086_s12 = smov %s3452_s14 }
 0x28c   : > { %p11_p9 = scmp.ge.s32.totalorder %s14_s16, 6   ;;  %s4087_s13 = smov %s3456_s15 }
 0x28d   : > { %s4088_s14 = smov %s4091_s17  ;;  %s4089_s15 = smov %s4095_s18 }
 0x28e   :  { %13 = sbr.rel (!%p11_p9) target bundleno = 3 (0x3), region = 77 }

// kernel: conv_block_forward.3
= control target key start
LH: loop header
LB: loop body
LE: loop exit
PB: predicated region body
PF: predicated region fallthrough
CT: control target
= control target key end

     0   :  { %s3349_s15 = smov 0   ;;  %s3351_s16 = smov 0   ;;  %s3943_s0 = inlined_call_operand.vmem [shape: f32[2,18,18,4], index: 0, kind: input, shape index: {}]   ;;  %s3944_s1 = inlined_call_operand.vmem [shape: f32[9,4,128], index: 1, kind: input, shape index: {}]   ;;  %s3945_s2 = inlined_call_operand.vmem [shape: f32[1,128], index: 2, kind: input, shape index: {}]   ;;  %s3946_s3 = inlined_call_operand.vmem [shape: f32[1,128], index: 3, kind: input, shape index: {}]   ;;  %s3947_s4 = inlined_call_operand.vmem [shape: f32[2,16,16,128], index: 4, kind: output, shape index: {}]  }
   0x1   :  { %s3353_s17 = smov 0   ;;  %s3355_s18 = smov 0  }
   0x2   :  { %s3357_s19 = smov 0  }
   0x3 LB: > { %s23_s20 = sadd.s32 1, %s3314_s17  ;;  %s26_s21 = sadd.s32 1, %s3318_s18  ;;  %s3322_s19 = sphi %s3357_s19, %s14_s19   ;;  %s3318_s18 = sphi %s3355_s18, %s3951_s18   ;;  %s3314_s17 = sphi %s3353_s17, %s3950_s17   ;;  %s3310_s16 = sphi %s3351_s16, %s3949_s16   ;;  %s3306_s15 = sphi %s3349_s15, %s3948_s15  }
   0x4   : > { %p24_p0 = scmp.ge.s32.totalorder %s23_s20, 2  ;;  %p2453_p1 = scmp.ge.s32.totalorder %s3322_s19, 1 }
   0x5   : > { %p176_p2 = scmp.lt.s32.totalorder %s3322_s19, 5 }
   0x6   : > { %s3953_s20 = smov (%p24_p0, %s23_s20), 0  ;;  %s3955_s21 = smov (!%p24_p0, %s26_s21), %s3318_s18 }
   0x7   : > { %p177_p3 = pnand %p2453_p1, %p176_p2  ;;  %p28_p4 = scmp.ge.s32.totalorder %s3955_s21, 2 }
   0x8   : > { %v2461_v0 = vld [vmem:[%s3944_s1 + $0x4] sm:$0xf] (!%p177_p3)  ;;  %vm310_vm0 = vcmask (!%p177_p3), 1043456   ;;  %v3387_v1 = vld [vmem:[%s3944_s1 + $0x10] sm:$0xf] (!%p177_p3)  ;;  %p207_p5 = scmp.lt.s32.totalorder (!%p177_p3), %s3310_s16, 1 }
   0x9   : > { %s3957_s21 = smov (%p28_p4, %s3955_s21), 0  ;;  %180 = sbr.rel (%p177_p3) target bundleno = 385 (0x181), region = 36 }
   0xa   : > { %2879 = vmatprep.subr.msk.mxu1 (!%p177_p3), %vm310_vm0, %v2461_v0  ;;  %2983 = vmatprep.subr.msk.mxu0 (!%p177_p3), %vm310_vm0, %v3387_v1  ;;  %v242_v2 = vld [vmem:[%s3944_s1] sm:$0xf] (!%p177_p3)  ;;  %v2600_v3 = vld [vmem:[%s3944_s1 + $0x14] sm:$0xf] (!%p177_p3)  ;;  %s2460_s30 = smul.u32 (!%p177_p3), 192, %s3306_s15  ;;  %vm261_vm1 = vcmask (!%p177_p3), 31744  }
   0xb   : > { %2880 = vmatpush3.msk.msra.mxu1 (!%p177_p3), %vm310_vm0, %v2461_v0  ;;  %2984 = vmatpush3.msk.msra.mxu0 (!%p177_p3), %vm310_vm0, %v3387_v1  ;;  %v2636_v9 = vld [vmem:[%s3944_s1 + $0x18] sm:$0xf] (!%p177_p3)  ;;  %v3429_v10 = vld [vmem:[%s3944_s1 + $0x8] sm:$0xf] (!%p177_p3)  ;;  %v3492_v20 = vld [vmem:[%s3944_s1 + $0x1c] sm:$0xf] (!%p177_p3) }
   0xc   : > { %2905 = vmatprep.subr.msk.mxu1 (!%p177_p3), %vm310_vm0, %v242_v2  ;;  %3009 = vmatprep.subr.msk.mxu0 (!%p177_p3), %vm310_vm0, %v2600_v3  ;;  %v2532_v37 = vld [vmem:[%s3944_s1 + $0xc] sm:$0xf] (!%p177_p3)  ;;  %v2704_v51 = vld [vmem:[%s3944_s1 + $0x20] sm:$0xf] (!%p177_p3)  ;;  %s2455_s27 = sshll.u32 (!%p177_p3), %s3306_s15, 3 }
   0xd   : > { %p215_p6 = scmp.lt.s32.totalorder (!%p177_p3), %s2455_s27, 15 }
  0x10   : > { %s3959_s16 = smov (!%p207_p5, %s3310_s16), 1  ;;  %s3961_s27 = smov (!%p215_p6, %s2455_s27), 15 }
  0x11   : > { %s3243_s5 = smul.u32 432, %s3959_s16  ;;  %s2456_s28 = sshll.u32 %s3961_s27, 1 }
  0x12   : > { %s2457_s29 = sshll.u32 %s3959_s16, 5 }
  0x13   : > { %s211_s8 = scalar_lea.vmem %s3943_s0, %s3243_s5 }
  0x14   : > { %s3410_s9 = scalar_lea.vmem %s211_s8, %s2460_s30  ;;  %s219_s30 = sadd.s32 %s2457_s29, %s2456_s28 }
  0x15   : > { %v243_v4 = vld [vmem:[%s3410_s9 + $0x1] sm:$0xff]  ;;  %v2550_v5 = vld [vmem:[%s3410_s9 + $0x19] sm:$0xff]  ;;  %v244_v6 = vld [vmem:[%s3410_s9 + $0x9] sm:$0xff]  ;;  %s2458_s8 = sshll.u32 %s219_s30, 3 }
  0x16   : > { %2881 = vmatprep.mubr.msk.f32.mxu1 %vm261_vm1, %v243_v4  ;;  %2985 = vmatprep.mubr.msk.f32.mxu0 %vm261_vm1, %v2550_v5  ;;  %v2551_v7 = vld [vmem:[%s3410_s9 + $0x21] sm:$0xff]  ;;  %v3419_v8 = vld [vmem:[%s3410_s9 + $0x31] sm:$0xff]  ;;  %v3434_v11 = vld [vmem:[%s3410_s9 + $0x39] sm:$0xff]  ;;  %s3881_s10 = scalar_lea.vmem %s3947_s4, %s2458_s8 }
  0x17   : > { %2882 = vmatmul.mubr.msk.f32.vlgmr.msra.gmra.mrb[0].mxu1 %vm261_vm1, %v244_v6  ;;  %2986 = vmatmul.mubr.msk.f32.vlgmr.msra.gmra.mrb[0].mxu0 %vm261_vm1, %v2551_v7  ;;  %v3440_v12 = vld [vmem:[%s3410_s9 + $0x49] sm:$0xff]  ;;  %v3453_v13 = vld [vmem:[%s3410_s9 + $0x51] sm:$0xff]  ;;  %v3456_v14 = vld [vmem:[%s3410_s9 + $0x61] sm:$0xff] }
  0x18   : > { %2906 = vmatpush3.msk.msra.mxu1 %vm310_vm0, %v242_v2  ;;  %3010 = vmatpush3.msk.msra.mxu0 %vm310_vm0, %v2600_v3  ;;  %v3467_v15 = vld [vmem:[%s3410_s9 + $0x69] sm:$0xff]  ;;  %v3470_v16 = vld [vmem:[%s3410_s9 + $0x1a] sm:$0xff]  ;;  %v3487_v19 = vld [vmem:[%s3410_s9 + $0x32] sm:$0xff] }
  0x19   : > { %2884 = vmatprep.mubr.msk.f32.mxu1 %vm261_vm1, %v2550_v5  ;;  %2988 = vmatprep.mubr.msk.f32.mxu0 %vm261_vm1, %v3419_v8  ;;  %v3481_v17 = vld [vmem:[%s3410_s9 + $0x22] sm:$0xff]  ;;  %v3484_v18 = vld [vmem:[%s3410_s9 + $0x79] sm:$0xff]  ;;  %v3510_v23 = vld [vmem:[%s3410_s9 + $0x91] sm:$0xff] }
  0x1a   : > { %3035 = vmatprep.subr.msk.mxu0 %vm310_vm0, %v2636_v9  ;;  %2931 = vmatprep.subr.msk.mxu1 %vm310_vm0, %v3429_v10  ;;  %v3502_v21 = vld [vmem:[%s3410_s9 + $0x81] sm:$0xff]  ;;  %v3513_v24 = vld [vmem:[%s3410_s9 + $0x4a] sm:$0xff]  ;;  %v3526_v25 = vld [vmem:[%s3410_s9 + $0x99] sm:$0xff] }
  0x1b   : > { %2885 = vmatmul.mubr.msk.f32.gmra.mrb[2].mxu1 %vm261_vm1, %v2551_v7  ;;  %2989 = vmatmul.mubr.msk.f32.gmra.mrb[2].mxu0 %vm261_vm1, %v3434_v11  ;;  %v3505_v22 = vld [vmem:[%s3410_s9 + $0x3a] sm:$0xff]  ;;  %v3529_v26 = vld [vmem:[%s3410_s9 + $0x52] sm:$0xff]  ;;  %v3532_v27 = vld [vmem:[%s3410_s9 + $0xa9] sm:$0xff] }
  0x1c   : > { %2887 = vmatprep.mubr.msk.f32.mxu1 %vm261_vm1, %v3419_v8  ;;  %2991 = vmatprep.mubr.msk.f32.mxu0 %vm261_vm1, %v3440_v12  ;;  %v3535_v28 = vld [vmem:[%s3410_s9 + $0x62] sm:$0xff]  ;;  %v3546_v29 = vld [vmem:[%s3410_s9 + $0xb1] sm:$0xff]  ;;  %v3553_v32 = vld [vmem:[%s3410_s9 + $0x7a] sm:$0xff] }
  0x1d   : > { %v3549_v30 = vld [vmem:[%s3410_s9 + $0x6a] sm:$0xff]  ;;  %v226_v31 = vld [vmem:[%s3410_s9] sm:$0xff]  ;;  %v3567_v35 = vld [vmem:[%s3410_s9 + $0x18] sm:$0xff] }
  0x1e   : > { %v227_v33 = vld [vmem:[%s3410_s9 + $0x8] sm:$0xff]  ;;  %v3570_v36 = vld [vmem:[%s3410_s9 + $0x92] sm:$0xff]  ;;  %v3583_v38 = vld [vmem:[%s3410_s9 + $0x20] sm:$0xff] }
  0x1f   : > { %2888 = vmatmul.mubr.msk.f32.gmra.mrb[4].mxu1 %vm261_vm1, %v3434_v11  ;;  %2992 = vmatmul.mubr.msk.f32.gmra.mrb[4].mxu0 %vm261_vm1, %v3453_v13  ;;  %v3564_v34 = vld [vmem:[%s3410_s9 + $0x82] sm:$0xff]  ;;  %v3586_v39 = vld [vmem:[%s3410_s9 + $0x9a] sm:$0xff]  ;;  %v3591_v40 = vld [vmem:[%s3410_s9 + $0x30] sm:$0xff] }
  0x20   : > { %2890 = vmatprep.mubr.msk.f32.mxu1 %vm261_vm1, %v3440_v12  ;;  %2994 = vmatprep.mubr.msk.f32.mxu0 %vm261_vm1, %v3456_v14  ;;  %v3594_v41 = vld [vmem:[%s3410_s9 + $0xaa] sm:$0xff]  ;;  %v3606_v42 = vld [vmem:[%s3410_s9 + $0x38] sm:$0xff]  ;;  %v3615_v45 = vld [vmem:[%s3410_s9 + $0xc2] sm:$0xff] }
  0x21   : > { %v3609_v43 = vld [vmem:[%s3410_s9 + $0xb2] sm:$0xff]  ;;  %v3612_v44 = vld [vmem:[%s3410_s9 + $0x48] sm:$0xff]  ;;  %v3632_v48 = vld [vmem:[%s3410_s9 + $0x60] sm:$0xff] }
  0x22   : > { %v3626_v46 = vld [vmem:[%s3410_s9 + $0x50] sm:$0xff]  ;;  %v3643_v49 = vld [vmem:[%s3410_s9 + $0x68] sm:$0xff]  ;;  %v3646_v50 = vld [vmem:[%s3410_s9 + $0x78] sm:$0xff] }
  0x23   : > { %2891 = vmatmul.mubr.msk.f32.gmra.mrb[6].mxu1 %vm261_vm1, %v3453_v13  ;;  %2995 = vmatmul.mubr.msk.f32.gmra.mrb[6].mxu0 %vm261_vm1, %v3467_v15  ;;  %v3629_v47 = vld [vmem:[%s3410_s9 + $0xca] sm:$0xff]  ;;  %v3660_v52 = vld [vmem:[%s3410_s9 + $0x80] sm:$0xff]  ;;  %v3677_v54 = vld [vmem:[%s3410_s9 + $0x98] sm:$0xff] }
  0x24   : > { %2893 = vmatprep.mubr.msk.f32.mxu1 %vm261_vm1, %v3456_v14  ;;  %3011 = vmatprep.mubr.msk.f32.mxu0 %vm261_vm1, %v3470_v16  ;;  %v3665_v53 = vld [vmem:[%s3410_s9 + $0x90] sm:$0xff]  ;;  %v3680_v55 = vld [vmem:[%s3410_s9 + $0xa8] sm:$0xff]  ;;  %v3711_v59 = vld [vmem:[%s3410_s9 + $0xc0] sm:$0xff] }
  0x25   : > { %v3691_v56 = vld [vmem:[%s3410_s9 + $0xb0] sm:$0xff]  ;;  %v655_v57 = vld [vmem:[%s3410_s9 + $0x2] sm:$0xff]  ;;  %v2634_v61 = vld [vmem:[%s3410_s9 + $0xd8] sm:$0xff] }
  0x26   : > { %v656_v58 = vld [vmem:[%s3410_s9 + $0xa] sm:$0xff]  ;;  %v2635_v62 = vld [vmem:[%s3410_s9 + $0xe0] sm:$0xff] }
  0x27   : > { %2894 = vmatmul.mubr.msk.f32.gmra.mrb[8].mxu1 %vm261_vm1, %v3467_v15  ;;  %3012 = vmatmul.mubr.msk.f32.vlgmr.msra.gmra.mrb[0].mxu0 %vm261_vm1, %v3481_v17  ;;  %v2633_v60 = vld [vmem:[%s3410_s9 + $0xc8] sm:$0xff]  ;;  %v2702_v3 = vld [vmem:[%s3410_s9 + $0xda] sm:$0xff] }
  0x28   : > { %3036 = vmatpush3.msk.msra.mxu0 %vm310_vm0, %v2636_v9  ;;  %2896 = vmatprep.mubr.msk.f32.mxu1 %vm261_vm1, %v3484_v18  ;;  %v2666_v63 = vld [vmem:[%s3410_s9 + $0xc1] sm:$0xff]  ;;  %v2667_v0 = vld [vmem:[%s3410_s9 + $0xc9] sm:$0xff] }
  0x29   : > { %3014 = vmatprep.mubr.msk.f32.mxu0 %vm261_vm1, %v3487_v19  ;;  %3061 = vmatprep.subr.msk.mxu0 %vm310_vm0, %v3492_v20  ;;  %v2669_v2 = vld [vmem:[%s3410_s9 + $0xe1] sm:$0xff] }
  0x2a   : > { %v2703_v4 = vld [vmem:[%s3410_s9 + $0xe2] sm:$0xff] }
  0x2b   : > { %2897 = vmatmul.mubr.msk.f32.gmra.mrb[10].mxu1 %vm261_vm1, %v3502_v21  ;;  %3015 = vmatmul.mubr.msk.f32.gmra.mrb[2].mxu0 %vm261_vm1, %v3505_v22 }
  0x2c   : > { %2899 = vmatprep.mubr.msk.f32.mxu1 %vm261_vm1, %v3510_v23  ;;  %3017 = vmatprep.mubr.msk.f32.mxu0 %vm261_vm1, %v3513_v24 }
  0x2f   : > { %2900 = vmatmul.mubr.msk.f32.gmra.mrb[12].mxu1 %vm261_vm1, %v3526_v25  ;;  %3018 = vmatmul.mubr.msk.f32.gmra.mrb[4].mxu0 %vm261_vm1, %v3529_v26 }
  0x30   : > { %2902 = vmatprep.mubr.msk.f32.mxu1 %vm261_vm1, %v3532_v27  ;;  %3020 = vmatprep.mubr.msk.f32.mxu0 %vm261_vm1, %v3535_v28 }
  0x33   : > { %2903 = vmatmul.mubr.msk.f32.gmra.mrb[14].mxu1 %vm261_vm1, %v3546_v29  ;;  %3021 = vmatmul.mubr.msk.f32.gmra.mrb[6].mxu0 %vm261_vm1, %v3549_v30 }
  0x34   : > { %2907 = vmatprep.mubr.msk.f32.mxu1 %vm261_vm1, %v226_v31  ;;  %3023 = vmatprep.mubr.msk.f32.mxu0 %vm261_vm1, %v3553_v32 }
  0x37   : > { %2908 = vmatmul.mubr.msk.f32.vlgmr.msra.gmra.mrb[0].mxu1 %vm261_vm1, %v227_v33  ;;  %3024 = vmatmul.mubr.msk.f32.gmra.mrb[8].mxu0 %vm261_vm1, %v3564_v34 }
  0x38   : > { %2932 = vmatpush3.msk.msra.mxu1 %vm310_vm0, %v3429_v10  ;;  %2910 = vmatprep.mubr.msk.f32.mxu1 %vm261_vm1, %v3567_v35 }
  0x39   : > { %3026 = vmatprep.mubr.msk.f32.mxu0 %vm261_vm1, %v3570_v36  ;;  %2957 = vmatprep.subr.msk.mxu1 %vm310_vm0, %v2532_v37 }
  0x3b   : > { %2911 = vmatmul.mubr.msk.f32.gmra.mrb[2].mxu1 %vm261_vm1, %v3583_v38  ;;  %3027 = vmatmul.mubr.msk.f32.gmra.mrb[10].mxu0 %vm261_vm1, %v3586_v39 }
  0x3c   : > { %2913 = vmatprep.mubr.msk.f32.mxu1 %vm261_vm1, %v3591_v40  ;;  %3029 = vmatprep.mubr.msk.f32.mxu0 %vm261_vm1, %v3594_v41 }
  0x3f   : > { %2914 = vmatmul.mubr.msk.f32.gmra.mrb[4].mxu1 %vm261_vm1, %v3606_v42  ;;  %3030 = vmatmul.mubr.msk.f32.gmra.mrb[12].mxu0 %vm261_vm1, %v3609_v43 }
  0x40   : > { %2916 = vmatprep.mubr.msk.f32.mxu1 %vm261_vm1, %v3612_v44  ;;  %3032 = vmatprep.mubr.msk.f32.mxu0 %vm261_vm1, %v3615_v45 }
  0x43   : > { %2917 = vmatmul.mubr.msk.f32.gmra.mrb[6].mxu1 %vm261_vm1, %v3626_v46  ;;  %3033 = vmatmul.mubr.msk.f32.gmra.mrb[14].mxu0 %vm261_vm1, %v3629_v47 }
  0x44   : > { %2919 = vmatprep.mubr.msk.f32.mxu1 %vm261_vm1, %v3632_v48  ;;  %3037 = vmatprep.mubr.msk.f32.mxu0 %vm261_vm1, %v3591_v40 }
  0x47   : > { %2920 = vmatmul.mubr.msk.f32.gmra.mrb[8].mxu1 %vm261_vm1, %v3643_v49  ;;  %3038 = vmatmul.mubr.msk.f32.vlgmr.msra.gmra.mrb[0].mxu0 %vm261_vm1, %v3606_v42 }
  0x48   : > { %3062 = vmatpush3.msk.msra.mxu0 %vm310_vm0, %v3492_v20  ;;  %2922 = vmatprep.mubr.msk.f32.mxu1 %vm261_vm1, %v3646_v50 }
  0x49   : > { %3040 = vmatprep.mubr.msk.f32.mxu0 %vm261_vm1, %v3612_v44  ;;  %3087 = vmatprep.subr.msk.mxu0 %vm310_vm0, %v2704_v51 }
  0x4b   : > { %2923 = vmatmul.mubr.msk.f32.gmra.mrb[10].mxu1 %vm261_vm1, %v3660_v52  ;;  %3041 = vmatmul.mubr.msk.f32.gmra.mrb[2].mxu0 %vm261_vm1, %v3626_v46 }
  0x4c   : > { %2925 = vmatprep.mubr.msk.f32.mxu1 %vm261_vm1, %v3665_v53  ;;  %3043 = vmatprep.mubr.msk.f32.mxu0 %vm261_vm1, %v3632_v48 }
  0x4f   : > { %2926 = vmatmul.mubr.msk.f32.gmra.mrb[12].mxu1 %vm261_vm1, %v3677_v54  ;;  %3044 = vmatmul.mubr.msk.f32.gmra.mrb[4].mxu0 %vm261_vm1, %v3643_v49 }
  0x50   : > { %2928 = vmatprep.mubr.msk.f32.mxu1 %vm261_vm1, %v3680_v55  ;;  %3046 = vmatprep.mubr.msk.f32.mxu0 %vm261_vm1, %v3646_v50 }
  0x53   : > { %2929 = vmatmul.mubr.msk.f32.gmra.mrb[14].mxu1 %vm261_vm1, %v3691_v56  ;;  %3047 = vmatmul.mubr.msk.f32.gmra.mrb[6].mxu0 %vm261_vm1, %v3660_v52 }
  0x54   : > { %2933 = vmatprep.mubr.msk.f32.mxu1 %vm261_vm1, %v655_v57  ;;  %3049 = vmatprep.mubr.msk.f32.mxu0 %vm261_vm1, %v3665_v53 }
  0x57   : > { %2934 = vmatmul.mubr.msk.f32.vlgmr.msra.gmra.mrb[0].mxu1 %vm261_vm1, %v656_v58  ;;  %3050 = vmatmul.mubr.msk.f32.gmra.mrb[8].mxu0 %vm261_vm1, %v3677_v54 }
  0x58   : > { %2958 = vmatpush3.msk.msra.mxu1 %vm310_vm0, %v2532_v37  ;;  %2936 = vmatprep.mubr.msk.f32.mxu1 %vm261_vm1, %v3470_v16 }
  0x59   : > { %3052 = vmatprep.mubr.msk.f32.mxu0 %vm261_vm1, %v3680_v55  ;;  %3113 = vmatprep.subr.msk.mxu1 %vm310_vm0, %v3387_v1 }
  0x5b   : > { %2937 = vmatmul.mubr.msk.f32.gmra.mrb[2].mxu1 %vm261_vm1, %v3481_v17  ;;  %3053 = vmatmul.mubr.msk.f32.gmra.mrb[10].mxu0 %vm261_vm1, %v3691_v56  ;;  %v3873_v17 = vld [vmem:[%s3946_s3] ss:$0 sm:$0xff] }
  0x5c   : > { %2939 = vmatprep.mubr.msk.f32.mxu1 %vm261_vm1, %v3487_v19  ;;  %3055 = vmatprep.mubr.msk.f32.mxu0 %vm261_vm1, %v3711_v59 }
  0x5f   : > { %2940 = vmatmul.mubr.msk.f32.gmra.mrb[4].mxu1 %vm261_vm1, %v3505_v22  ;;  %3056 = vmatmul.mubr.msk.f32.gmra.mrb[12].mxu0 %vm261_vm1, %v2633_v60 }
  0x60   : > { %2942 = vmatprep.mubr.msk.f32.mxu1 %vm261_vm1, %v3513_v24  ;;  %3058 = vmatprep.mubr.msk.f32.mxu0 %vm261_vm1, %v2634_v61 }
  0x63   : > { %2943 = vmatmul.mubr.msk.f32.gmra.mrb[6].mxu1 %vm261_vm1, %v3529_v26  ;;  %3059 = vmatmul.mubr.msk.f32.gmra.mrb[14].mxu0 %vm261_vm1, %v2635_v62 }
  0x64   : > { %2945 = vmatprep.mubr.msk.f32.mxu1 %vm261_vm1, %v3535_v28  ;;  %3063 = vmatprep.mubr.msk.f32.mxu0 %vm261_vm1, %v3419_v8 }
  0x67   : > { %2946 = vmatmul.mubr.msk.f32.gmra.mrb[8].mxu1 %vm261_vm1, %v3549_v30  ;;  %3064 = vmatmul.mubr.msk.f32.vlgmr.msra.gmra.mrb[0].mxu0 %vm261_vm1, %v3434_v11 }
  0x68   : > { %3088 = vmatpush3.msk.msra.mxu0 %vm310_vm0, %v2704_v51  ;;  %2948 = vmatprep.mubr.msk.f32.mxu1 %vm261_vm1, %v3553_v32 }
  0x69   : > { %3066 = vmatprep.mubr.msk.f32.mxu0 %vm261_vm1, %v3440_v12 }
  0x6b   : > { %2949 = vmatmul.mubr.msk.f32.gmra.mrb[10].mxu1 %vm261_vm1, %v3564_v34  ;;  %3067 = vmatmul.mubr.msk.f32.gmra.mrb[2].mxu0 %vm261_vm1, %v3453_v13 }
  0x6c   : > { %2951 = vmatprep.mubr.msk.f32.mxu1 %vm261_vm1, %v3570_v36  ;;  %3069 = vmatprep.mubr.msk.f32.mxu0 %vm261_vm1, %v3456_v14  ;;  %v3868_v14 = vld [vmem:[%s3945_s2] ss:$0 sm:$0xff] }
  0x6f   : > { %2952 = vmatmul.mubr.msk.f32.gmra.mrb[12].mxu1 %vm261_vm1, %v3586_v39  ;;  %3070 = vmatmul.mubr.msk.f32.gmra.mrb[4].mxu0 %vm261_vm1, %v3467_v15 }
  0x70   : > { %2954 = vmatprep.mubr.msk.f32.mxu1 %vm261_vm1, %v3594_v41  ;;  %3072 = vmatprep.mubr.msk.f32.mxu0 %vm261_vm1, %v3484_v18 }
  0x73   : > { %2955 = vmatmul.mubr.msk.f32.gmra.mrb[14].mxu1 %vm261_vm1, %v3609_v43  ;;  %3073 = vmatmul.mubr.msk.f32.gmra.mrb[6].mxu0 %vm261_vm1, %v3502_v21 }
  0x74   : > { %2959 = vmatprep.mubr.msk.f32.mxu1 %vm261_vm1, %v3567_v35  ;;  %3075 = vmatprep.mubr.msk.f32.mxu0 %vm261_vm1, %v3510_v23 }
  0x77   : > { %2960 = vmatmul.mubr.msk.f32.vlgmr.msra.gmra.mrb[0].mxu1 %vm261_vm1, %v3583_v38  ;;  %3076 = vmatmul.mubr.msk.f32.gmra.mrb[8].mxu0 %vm261_vm1, %v3526_v25 }
  0x78   : > { %3114 = vmatpush3.msk.msra.mxu1 %vm310_vm0, %v3387_v1  ;;  %2962 = vmatprep.mubr.msk.f32.mxu1 %vm261_vm1, %v3591_v40  ;;  %v2668_v1 = vld [vmem:[%s3410_s9 + $0xd9] sm:$0xff] }
  0x79   : > { %3078 = vmatprep.mubr.msk.f32.mxu0 %vm261_vm1, %v3532_v27 }
  0x7b   : > { %2963 = vmatmul.mubr.msk.f32.gmra.mrb[2].mxu1 %vm261_vm1, %v3606_v42  ;;  %3079 = vmatmul.mubr.msk.f32.gmra.mrb[10].mxu0 %vm261_vm1, %v3546_v29 }
  0x7c   : > { %2965 = vmatprep.mubr.msk.f32.mxu1 %vm261_vm1, %v3612_v44  ;;  %3081 = vmatprep.mubr.msk.f32.mxu0 %vm261_vm1, %v2666_v63 }
  0x7f   : > { %2966 = vmatmul.mubr.msk.f32.gmra.mrb[4].mxu1 %vm261_vm1, %v3626_v46  ;;  %3082 = vmatmul.mubr.msk.f32.gmra.mrb[12].mxu0 %vm261_vm1, %v2667_v0 }
  0x80   : > { %2968 = vmatprep.mubr.msk.f32.mxu1 %vm261_vm1, %v3632_v48  ;;  %3084 = vmatprep.mubr.msk.f32.mxu0 %vm261_vm1, %v2668_v1 }
  0x83   : > { %2969 = vmatmul.mubr.msk.f32.gmra.mrb[6].mxu1 %vm261_vm1, %v3643_v49  ;;  %3085 = vmatmul.mubr.msk.f32.gmra.mrb[14].mxu0 %vm261_vm1, %v2669_v2 }
  0x84   : > { %2971 = vmatprep.mubr.msk.f32.mxu1 %vm261_vm1, %v3646_v50  ;;  %3089 = vmatprep.mubr.msk.f32.mxu0 %vm261_vm1, %v3487_v19 }
  0x87   : > { %2972 = vmatmul.mubr.msk.f32.gmra.mrb[8].mxu1 %vm261_vm1, %v3660_v52  ;;  %3090 = vmatmul.mubr.msk.f32.vlgmr.msra.gmra.mrb[0].mxu0 %vm261_vm1, %v3505_v22 }
  0x88   : > { %2974 = vmatprep.mubr.msk.f32.mxu1 %vm261_vm1, %v3665_v53  ;;  %3092 = vmatprep.mubr.msk.f32.mxu0 %vm261_vm1, %v3513_v24 }
  0x8b   : > { %2975 = vmatmul.mubr.msk.f32.gmra.mrb[10].mxu1 %vm261_vm1, %v3677_v54  ;;  %3093 = vmatmul.mubr.msk.f32.gmra.mrb[2].mxu0 %vm261_vm1, %v3529_v26 }
  0x8c   : > { %2977 = vmatprep.mubr.msk.f32.mxu1 %vm261_vm1, %v3680_v55  ;;  %3095 = vmatprep.mubr.msk.f32.mxu0 %vm261_vm1, %v3535_v28 }
  0x8f   : > { %2978 = vmatmul.mubr.msk.f32.gmra.mrb[12].mxu1 %vm261_vm1, %v3691_v56  ;;  %3096 = vmatmul.mubr.msk.f32.gmra.mrb[4].mxu0 %vm261_vm1, %v3549_v30 }
  0x90   : > { %2980 = vmatprep.mubr.msk.f32.mxu1 %vm261_vm1, %v3711_v59  ;;  %3098 = vmatprep.mubr.msk.f32.mxu0 %vm261_vm1, %v3553_v32 }
  0x93   : > { %2981 = vmatmul.mubr.msk.f32.gmra.mrb[14].mxu1 %vm261_vm1, %v2633_v60  ;;  %3099 = vmatmul.mubr.msk.f32.gmra.mrb[6].mxu0 %vm261_vm1, %v3564_v34 }
  0x94   : > { %2997 = vmatprep.mubr.msk.f32.mxu1 %vm261_vm1, %v3484_v18  ;;  %3101 = vmatprep.mubr.msk.f32.mxu0 %vm261_vm1, %v3570_v36 }
  0x97   : > { %2998 = vmatmul.mubr.msk.f32.vlgmr.msra.gmra.mrb[8].mxu1 %vm261_vm1, %v3502_v21  ;;  %3102 = vmatmul.mubr.msk.f32.gmra.mrb[8].mxu0 %vm261_vm1, %v3586_v39 }
  0x98   : > { %3000 = vmatprep.mubr.msk.f32.mxu1 %vm261_vm1, %v3510_v23  ;;  %3104 = vmatprep.mubr.msk.f32.mxu0 %vm261_vm1, %v3594_v41 }
  0x9b   : > { %3001 = vmatmul.mubr.msk.f32.gmra.mrb[10].mxu1 %vm261_vm1, %v3526_v25  ;;  %3105 = vmatmul.mubr.msk.f32.gmra.mrb[10].mxu0 %vm261_vm1, %v3609_v43 }
  0x9c   : > { %3003 = vmatprep.mubr.msk.f32.mxu1 %vm261_vm1, %v3532_v27  ;;  %3107 = vmatprep.mubr.msk.f32.mxu0 %vm261_vm1, %v3615_v45 }
  0x9f   : > { %3004 = vmatmul.mubr.msk.f32.gmra.mrb[12].mxu1 %vm261_vm1, %v3546_v29  ;;  %3108 = vmatmul.mubr.msk.f32.gmra.mrb[12].mxu0 %vm261_vm1, %v3629_v47 }
  0xa0   : > { %3006 = vmatprep.mubr.msk.f32.mxu1 %vm261_vm1, %v2666_v63  ;;  %3110 = vmatprep.mubr.msk.f32.mxu0 %vm261_vm1, %v2702_v3 }
  0xa3   : > { %3007 = vmatmul.mubr.msk.f32.gmra.mrb[14].mxu1 %vm261_vm1, %v2667_v0  ;;  %3111 = vmatmul.mubr.msk.f32.gmra.mrb[14].mxu0 %vm261_vm1, %v2703_v4 }
 0x14a   : > { %v2961_v5 = vpop.f32.mrb[0].mxu1 }
 0x14b   : > { %v1023_v6 = vpop.f32.mrb[1].mxu1 }
 0x14e   : > { %v2964_v7 = vpop.f32.mrb[2].mxu1 }
 0x14f   : > { %v1033_v8 = vpop.f32.mrb[3].mxu1 }
 0x152   : > { %v2967_v9 = vpop.f32.mrb[4].mxu1 }
 0x153   : > { %v1043_v10 = vpop.f32.mrb[5].mxu1 }
 0x156   : > { %v2970_v11 = vpop.f32.mrb[6].mxu1 }
 0x157   : > { %v1053_v12 = vpop.f32.mrb[7].mxu1 }
 0x15a   : > { %v3091_v13 = vpop.f32.mrb[0].mxu0 }
 0x15b   : > { %v3115_v15 = vadd.f32 %v3091_v13, %v2961_v5  ;;  %v2176_v16 = vpop.f32.mrb[1].mxu0 }
 0x15c   : > { %v3116_v18 = vadd.f32 %v2176_v16, %v1023_v6 }
 0x15d   : > { %v2279_v19 = vmul.f32 %v3115_v15, %v3868_v14 }
 0x15e   : > { %v2278_v20 = vmul.f32 %v3116_v18, %v3868_v14  ;;  %v3094_v21 = vpop.f32.mrb[2].mxu0 }
 0x15f   : > { %v2302_v22 = vadd.f32 %v3873_v17, %v2279_v19  ;;  %v3117_v23 = vadd.f32 %v3094_v21, %v2964_v7  ;;  %v2186_v24 = vpop.f32.mrb[3].mxu0 }
 0x160   : > { %v2301_v25 = vadd.f32 %v3873_v17, %v2278_v20  ;;  %v3118_v26 = vadd.f32 %v2186_v24, %v1033_v8 }
 0x161   : > { %v2318_v27 = vmax.f32 %v2302_v22, 0.0  ;;  %v2281_v28 = vmul.f32 %v3117_v23, %v3868_v14 }
 0x162   : > { %v2317_v29 = vmax.f32 %v2301_v25, 0.0  ;;  %v2280_v30 = vmul.f32 %v3118_v26, %v3868_v14  ;;  %v3097_v31 = vpop.f32.mrb[4].mxu0 }
 0x163   : > { %2334 = vst [vmem:[%s3881_s10 + $0x8] sm:$0xff] %v2318_v27  ;;  %v2304_v32 = vadd.f32 %v3873_v17, %v2281_v28  ;;  %v3119_v33 = vadd.f32 %v3097_v31, %v2967_v9  ;;  %v2196_v34 = vpop.f32.mrb[5].mxu0 }
 0x164   : > { %2333 = vst [vmem:[%s3881_s10] sm:$0xff] %v2317_v29  ;;  %v2303_v35 = vadd.f32 %v3873_v17, %v2280_v30  ;;  %v3120_v36 = vadd.f32 %v2196_v34, %v1043_v10 }
 0x165   : > { %v2320_v37 = vmax.f32 %v2304_v32, 0.0  ;;  %v2283_v38 = vmul.f32 %v3119_v33, %v3868_v14 }
 0x166   : > { %v2319_v39 = vmax.f32 %v2303_v35, 0.0  ;;  %v2282_v40 = vmul.f32 %v3120_v36, %v3868_v14  ;;  %v3100_v41 = vpop.f32.mrb[6].mxu0 }
 0x167   : > { %2336 = vst [vmem:[%s3881_s10 + $0x18] sm:$0xff] %v2320_v37  ;;  %v2306_v42 = vadd.f32 %v3873_v17, %v2283_v38  ;;  %v3121_v43 = vadd.f32 %v3100_v41, %v2970_v11  ;;  %v2206_v44 = vpop.f32.mrb[7].mxu0 }
 0x168   : > { %2335 = vst [vmem:[%s3881_s10 + $0x10] sm:$0xff] %v2319_v39  ;;  %v2305_v45 = vadd.f32 %v3873_v17, %v2282_v40  ;;  %v3122_v46 = vadd.f32 %v2206_v44, %v1053_v12 }
 0x169   : > { %v2322_v47 = vmax.f32 %v2306_v42, 0.0  ;;  %v2285_v48 = vmul.f32 %v3121_v43, %v3868_v14 }
 0x16a   : > { %v2321_v49 = vmax.f32 %v2305_v45, 0.0  ;;  %v2284_v50 = vmul.f32 %v3122_v46, %v3868_v14  ;;  %v2999_v51 = vpop.f32.mrb[8].mxu1  ;;  %v3103_v52 = vpop.f32.mrb[8].mxu0 }
 0x16b   : > { %2338 = vst [vmem:[%s3881_s10 + $0x28] sm:$0xff] %v2322_v47  ;;  %v2308_v53 = vadd.f32 %v3873_v17, %v2285_v48  ;;  %v3123_v54 = vadd.f32 %v3103_v52, %v2999_v51  ;;  %v1293_v55 = vpop.f32.mrb[9].mxu1  ;;  %v2216_v56 = vpop.f32.mrb[9].mxu0 }
 0x16c   : > { %2337 = vst [vmem:[%s3881_s10 + $0x20] sm:$0xff] %v2321_v49  ;;  %v2307_v57 = vadd.f32 %v3873_v17, %v2284_v50  ;;  %v3124_v58 = vadd.f32 %v2216_v56, %v1293_v55 }
 0x16d   : > { %v2324_v59 = vmax.f32 %v2308_v53, 0.0  ;;  %v2287_v60 = vmul.f32 %v3123_v54, %v3868_v14 }
 0x16e   : > { %v2323_v61 = vmax.f32 %v2307_v57, 0.0  ;;  %v2286_v62 = vmul.f32 %v3124_v58, %v3868_v14  ;;  %v3002_v63 = vpop.f32.mrb[10].mxu1  ;;  %v3106_v0 = vpop.f32.mrb[10].mxu0 }
 0x16f   : > { %2340 = vst [vmem:[%s3881_s10 + $0x38] sm:$0xff] %v2324_v59  ;;  %v2310_v1 = vadd.f32 %v3873_v17, %v2287_v60  ;;  %v3125_v2 = vadd.f32 %v3106_v0, %v3002_v63  ;;  %v1303_v3 = vpop.f32.mrb[11].mxu1  ;;  %v2226_v4 = vpop.f32.mrb[11].mxu0 }
 0x170   : > { %2339 = vst [vmem:[%s3881_s10 + $0x30] sm:$0xff] %v2323_v61  ;;  %v2309_v5 = vadd.f32 %v3873_v17, %v2286_v62  ;;  %v3126_v6 = vadd.f32 %v2226_v4, %v1303_v3 }
 0x171   : > { %v2326_v7 = vmax.f32 %v2310_v1, 0.0  ;;  %v2289_v8 = vmul.f32 %v3125_v2, %v3868_v14 }
 0x172   : > { %v2325_v9 = vmax.f32 %v2309_v5, 0.0  ;;  %v2288_v10 = vmul.f32 %v3126_v6, %v3868_v14  ;;  %v3005_v11 = vpop.f32.mrb[12].mxu1  ;;  %v3109_v12 = vpop.f32.mrb[12].mxu0 }
 0x173   : > { %2342 = vst [vmem:[%s3881_s10 + $0x48] sm:$0xff] %v2326_v7  ;;  %v2312_v13 = vadd.f32 %v3873_v17, %v2289_v8  ;;  %v3127_v15 = vadd.f32 %v3109_v12, %v3005_v11  ;;  %v1313_v16 = vpop.f32.mrb[13].mxu1  ;;  %v2236_v18 = vpop.f32.mrb[13].mxu0 }
 0x174   : > { %2341 = vst [vmem:[%s3881_s10 + $0x40] sm:$0xff] %v2325_v9  ;;  %v2311_v19 = vadd.f32 %v3873_v17, %v2288_v10  ;;  %v3128_v20 = vadd.f32 %v2236_v18, %v1313_v16 }
 0x175   : > { %v2328_v21 = vmax.f32 %v2312_v13, 0.0  ;;  %v2291_v22 = vmul.f32 %v3127_v15, %v3868_v14 }
 0x176   : > { %v2327_v23 = vmax.f32 %v2311_v19, 0.0  ;;  %v2290_v24 = vmul.f32 %v3128_v20, %v3868_v14  ;;  %v3008_v25 = vpop.f32.mrb[14].mxu1  ;;  %v3112_v26 = vpop.f32.mrb[14].mxu0 }
 0x177   : > { %2344 = vst [vmem:[%s3881_s10 + $0x58] sm:$0xff] %v2328_v21  ;;  %v2314_v27 = vadd.f32 %v3873_v17, %v2291_v22  ;;  %v3129_v28 = vadd.f32 %v3112_v26, %v3008_v25  ;;  %v1323_v29 = vpop.f32.mrb[15].mxu1  ;;  %v2246_v30 = vpop.f32.mrb[15].mxu0 }
 0x178   : > { %2343 = vst [vmem:[%s3881_s10 + $0x50] sm:$0xff] %v2327_v23  ;;  %v2313_v31 = vadd.f32 %v3873_v17, %v2290_v24  ;;  %v3130_v32 = vadd.f32 %v2246_v30, %v1323_v29 }
 0x179   : > { %v2330_v33 = vmax.f32 %v2314_v27, 0.0  ;;  %v2293_v34 = vmul.f32 %v3129_v28, %v3868_v14 }
 0x17a   : > { %v2329_v35 = vmax.f32 %v2313_v31, 0.0  ;;  %v2292_v36 = vmul.f32 %v3130_v32, %v3868_v14 }
 0x17b   : > { %2346 = vst [vmem:[%s3881_s10 + $0x68] sm:$0xff] %v2330_v33  ;;  %v2316_v37 = vadd.f32 %v3873_v17, %v2293_v34 }
 0x17c   : > { %2345 = vst [vmem:[%s3881_s10 + $0x60] sm:$0xff] %v2329_v35  ;;  %v2315_v38 = vadd.f32 %v3873_v17, %v2292_v36 }
 0x17d   : > { %v2332_v39 = vmax.f32 %v2316_v37, 0.0 }
 0x17e   : > { %v2331_v40 = vmax.f32 %v2315_v38, 0.0 }
 0x17f   : > { %2348 = vst [vmem:[%s3881_s10 + $0x78] sm:$0xff] %v2332_v39 }
 0x180   : > { %2347 = vst [vmem:[%s3881_s10 + $0x70] sm:$0xff] %v2331_v40 }
 0x181 PF: > { %s14_s19 = sadd.s32 1, %s3322_s19   ;;  %s3948_s15 = smov %s3314_s17 }
 0x182   : > { %p11_p7 = scmp.ge.s32.totalorder %s14_s19, 6   ;;  %s3949_s16 = smov %s3318_s18 }
 0x183   : > { %s3950_s17 = smov %s3953_s20  ;;  %s3951_s18 = smov %s3957_s21 }
 0x184   :  { %13 = sbr.rel (!%p11_p7) target bundleno = 3 (0x3), region = 77 }

</bundles_post_ra>
